<compile_context>
chip_gen: v5e
topology: v5e:2x2
jax: 0.10.0
libtpu: 0.0.40
codegen_flags: <defaults>
</compile_context>

<pallas_src>
import functools
import math

import jax
import jax.numpy as jnp
import numpy as np
from jax import lax
from jax.experimental import pallas as pl
from jax.experimental.pallas import tpu as pltpu


def _round_up(x, m):
    return (x + m - 1) // m * m


def _lstm_kernel(gx_ref, len_ref, whh_ref, out_ref, h_s, c_s, *,
                 hidden_dim, t_block):
    """One grid step == T timesteps of the LSTMCell recurrence.

    gx_ref  : (T, Bp, 4Hp)  precomputed x@W_ih^T + bias for this time block
    len_ref : (Bp, 1)       int32 sequence lengths
    whh_ref : (Hp, 4Hp)     transposed (and gate-padded) weight_hh
    out_ref : (Bp, Hp)      final pooled hidden state (resident across grid)
    h_s,c_s : (Bp, Hp)      VMEM scratch carrying the recurrence state
    """
    blk = pl.program_id(0)

    @pl.when(blk == 0)
    def _():
        h_s[...] = jnp.zeros_like(h_s)
        c_s[...] = jnp.zeros_like(c_s)
        out_ref[...] = jnp.zeros_like(out_ref)

    # Hoisted out of the unrolled time loop.
    whh = whh_ref[...]                    # (Hp, 4Hp)
    lens_m1 = len_ref[...] - 1            # (Bp, 1) int32
    Hp = hidden_dim
    t0 = blk * t_block

    def step(i, carry):
        h_prev, c_prev, out = carry
        # Only the recurrent projection stays on the serial critical path.
        gates = gx_ref[i] + jnp.dot(h_prev, whh,
                                    preferred_element_type=jnp.float32)
        # Lane-aligned gate slices (Hp is a multiple of 128); order i, f, g, o.
        i_g = jax.nn.sigmoid(gates[:, 0 * Hp:1 * Hp])
        f_g = jax.nn.sigmoid(gates[:, 1 * Hp:2 * Hp])
        g_g = jnp.tanh(gates[:, 2 * Hp:3 * Hp])
        o_g = jax.nn.sigmoid(gates[:, 3 * Hp:4 * Hp])
        c_new = f_g * c_prev + i_g * g_g
        h_new = o_g * jnp.tanh(c_new)
        # pooling == 'final': keep h at position length-1 per batch element.
        out = jnp.where(lens_m1 == (t0 + i), h_new, out)
        return h_new, c_new, out

    h_f, c_f, out_f = lax.fori_loop(
        0, t_block, step, (h_s[...], c_s[...], out_ref[...]), unroll=True)
    h_s[...] = h_f
    c_s[...] = c_f
    out_ref[...] = out_f


def lstm_final_pooling(x_bld, length, w_ih, w_hh, b_ih, b_hh, *, t_block=8):
    """x_bld: (B, L, D) float32, length: (B,) int32. Returns (B, H) float32."""
    B, L, D = x_bld.shape
    H = w_hh.shape[1]

    # Pad batch to a sublane multiple and hidden to a lane multiple.
    Bp = _round_up(max(B, 8), 8)
    Hp = _round_up(max(H, 128), 128)
    T = max(1, min(t_block, L))
    Lp = _round_up(max(L, 1), T)

    # ---- hoisted input projection (one big matmul, bias folded in) ----
    bias = b_ih + b_hh                                        # (4H,)
    gx = jnp.einsum('bld,gd->blg', x_bld, w_ih) + bias        # (B, L, 4H)
    # Pad each gate chunk to Hp so in-kernel slices land on lane boundaries.
    gx = gx.reshape(B, L, 4, H)
    gx = jnp.pad(gx, ((0, Bp - B), (0, Lp - L), (0, 0), (0, Hp - H)))
    gx = gx.reshape(Bp, Lp, 4 * Hp).transpose(1, 0, 2)        # (Lp, Bp, 4Hp)

    # W_hh^T padded per-gate: column block g is w_hh[g*H:(g+1)*H, :]^T.
    whh_t = jnp.transpose(w_hh).reshape(H, 4, H)              # (H, 4, H)
    whh_t = jnp.pad(whh_t, ((0, Hp - H), (0, 0), (0, Hp - H)))
    whh_t = whh_t.reshape(Hp, 4 * Hp)                         # (Hp, 4Hp)

    # Padded batch rows get length 0 -> never selected -> stay zero.
    len2d = jnp.pad(length.astype(jnp.int32), (0, Bp - B)).reshape(Bp, 1)

    kernel = functools.partial(_lstm_kernel, hidden_dim=Hp, t_block=T)
    out = pl.pallas_call(
        kernel,
        out_shape=jax.ShapeDtypeStruct((Bp, Hp), jnp.float32),
        grid_spec=pltpu.PrefetchScalarGridSpec(
            num_scalar_prefetch=0,
            grid=(Lp // T,),
            in_specs=[
                pl.BlockSpec((T, Bp, 4 * Hp), lambda b: (b, 0, 0)),  # gates_x
                pl.BlockSpec((Bp, 1), lambda b: (0, 0)),             # lengths
                pl.BlockSpec((Hp, 4 * Hp), lambda b: (0, 0)),        # W_hh^T
            ],
            out_specs=pl.BlockSpec((Bp, Hp), lambda b: (0, 0)),      # resident
            scratch_shapes=[pltpu.VMEM((Bp, Hp), jnp.float32),
                            pltpu.VMEM((Bp, Hp), jnp.float32)],
        ),
        compiler_params=pltpu.CompilerParams(
            dimension_semantics=("arbitrary",)),  # sequential recurrence
    )(gx, len2d, whh_t)
    return out[:B, :H]


def lstm_ref(x, length, w_ih, w_hh, b_ih, b_hh):
    """Pure-JAX reference mirroring the PyTorch module's forward pass."""
    B, L, D = x.shape
    H = w_hh.shape[1]

    def cell(carry, x_t):
        h, c = carry
        gates = x_t @ w_ih.T + b_ih + h @ w_hh.T + b_hh
        i, f, g, o = jnp.split(gates, 4, axis=-1)
        c = jax.nn.sigmoid(f) * c + jax.nn.sigmoid(i) * jnp.tanh(g)
        h = jax.nn.sigmoid(o) * jnp.tanh(c)
        return (h, c), h

    init = (jnp.zeros((B, H), jnp.float32), jnp.zeros((B, H), jnp.float32))
    (_, _), hs = jax.lax.scan(cell, init, jnp.transpose(x, (1, 0, 2)))
    hs = jnp.transpose(hs, (1, 0, 2))                       # (B, L, H)
    mask = (jnp.arange(L)[None, :] < length[:, None]).astype(jnp.float32)
    nodes = hs * mask[:, :, None]
    return nodes[jnp.arange(B), length - 1]                 # (B, H)


def init_params(key, word_dim, hidden_dim):
    """Deterministic parameter init matching reset_parameters() semantics."""
    k1, k2 = jax.random.split(key)
    # kaiming_normal_ on weight_ih (4H, D): std = sqrt(2 / fan_in), fan_in = D
    w_ih = jax.random.normal(k1, (4 * hidden_dim, word_dim), jnp.float32) * \
        math.sqrt(2.0 / word_dim)
    # orthogonal_ on weight_hh (4H, H): orthonormal columns via QR
    a = jax.random.normal(k2, (4 * hidden_dim, hidden_dim), jnp.float32)
    q, _ = jnp.linalg.qr(a)
    w_hh = q.astype(jnp.float32)
    # biases: zeros, forget-gate chunk of bias_ih set to 1
    b_ih = jnp.zeros((4 * hidden_dim,), jnp.float32)
    b_ih = b_ih.at[hidden_dim:2 * hidden_dim].set(1.0)
    b_hh = jnp.zeros((4 * hidden_dim,), jnp.float32)
    return w_ih, w_hh, b_ih, b_hh


if __name__ == "__main__":
    B, L, D, H = 4, 8, 32, 32
    key = jax.random.PRNGKey(0)
    kx, kp = jax.random.split(key)

    x = jax.random.normal(kx, (B, L, D), jnp.float32)       # (batch, seq, word_dim)
    length = jnp.array([8, 5, 3, 1], jnp.int32)              # per-batch lengths
    w_ih, w_hh, b_ih, b_hh = init_params(kp, D, H)

    out = lstm_final_pooling(x, length, w_ih, w_hh, b_ih, b_hh)
    out = jax.block_until_ready(out)

    ref = jax.block_until_ready(lstm_ref(x, length, w_ih, w_hh, b_ih, b_hh))
    assert out.shape == (B, H)
    np.testing.assert_allclose(np.asarray(out), np.asarray(ref),
                               rtol=1e-3, atol=1e-3)
    print("KERNEL_OK")
</pallas_src>

<mosaic_0001>
module attributes {stable_mosaic.version = 11 : i64} {
  func.func @_lstm_kernel(%arg0: i32, %arg1: memref<8x8x512xf32, #tpu.memory_space<vmem>>, %arg2: memref<8x1xi32, #tpu.memory_space<vmem>>, %arg3: memref<128x512xf32, #tpu.memory_space<vmem>>, %arg4: memref<8x128xf32, #tpu.memory_space<vmem>>, %arg5: memref<8x128xf32, #tpu.memory_space<vmem>>, %arg6: memref<8x128xf32, #tpu.memory_space<vmem>>) attributes {dimension_semantics = [#tpu.dimension_semantics<arbitrary>], iteration_bounds = array<i64: 1>, scalar_prefetch = 0 : i64, scratch_operands = 2 : i64, tpu.core_type = #tpu.core_type<tc>, window_params = [{transform_indices = @transform_0, window_bounds = array<i64: 8, 8, 512>}, {pipeline_mode = #tpu.pipeline_mode<synchronous>, transform_indices = @transform_1, window_bounds = array<i64: 8, 1>}, {pipeline_mode = #tpu.pipeline_mode<synchronous>, transform_indices = @transform_2, window_bounds = array<i64: 128, 512>}, {pipeline_mode = #tpu.pipeline_mode<synchronous>, transform_indices = @transform_3, window_bounds = array<i64: 8, 128>}]} {
    %c0_i32 = arith.constant 0 : i32
    %0 = arith.cmpi eq, %arg0, %c0_i32 : i32
    %1 = arith.extui %0 : i1 to i32
    %c0_i32_0 = arith.constant 0 : i32
    %2 = arith.cmpi ne, %1, %c0_i32_0 : i32
    scf.if %2 {
      %cst_66 = arith.constant 0.000000e+00 : f32
      %302 = vector.broadcast %cst_66 : f32 to vector<8x128xf32>
      %c0_67 = arith.constant 0 : index
      %c0_68 = arith.constant 0 : index
      %303 = vector.load %arg5[%c0_67, %c0_68] : memref<8x128xf32, #tpu.memory_space<vmem>>, vector<8x128xf32>
      tpu.vector_store %arg5[%c0_67, %c0_68], %302 {strides = array<i32>} : memref<8x128xf32, #tpu.memory_space<vmem>>, vector<8x128xf32>,
      %cst_69 = arith.constant 0.000000e+00 : f32
      %304 = vector.broadcast %cst_69 : f32 to vector<8x128xf32>
      %c0_70 = arith.constant 0 : index
      %c0_71 = arith.constant 0 : index
      %305 = vector.load %arg6[%c0_70, %c0_71] : memref<8x128xf32, #tpu.memory_space<vmem>>, vector<8x128xf32>
      tpu.vector_store %arg6[%c0_70, %c0_71], %304 {strides = array<i32>} : memref<8x128xf32, #tpu.memory_space<vmem>>, vector<8x128xf32>,
      %cst_72 = arith.constant 0.000000e+00 : f32
      %306 = vector.broadcast %cst_72 : f32 to vector<8x128xf32>
      %c0_73 = arith.constant 0 : index
      %c0_74 = arith.constant 0 : index
      %307 = vector.load %arg4[%c0_73, %c0_74] : memref<8x128xf32, #tpu.memory_space<vmem>>, vector<8x128xf32>
      tpu.vector_store %arg4[%c0_73, %c0_74], %306 {strides = array<i32>} : memref<8x128xf32, #tpu.memory_space<vmem>>, vector<8x128xf32>,
    } else {
    }
    %c0 = arith.constant 0 : index
    %c0_1 = arith.constant 0 : index
    %3 = vector.load %arg3[%c0, %c0_1] : memref<128x512xf32, #tpu.memory_space<vmem>>, vector<128x512xf32>
    %c0_2 = arith.constant 0 : index
    %c0_3 = arith.constant 0 : index
    %4 = vector.load %arg2[%c0_2, %c0_3] : memref<8x1xi32, #tpu.memory_space<vmem>>, vector<8x1xi32>
    %c1_i32 = arith.constant 1 : i32
    %5 = vector.broadcast %c1_i32 : i32 to vector<8x1xi32>
    %6 = arith.subi %4, %5 : vector<8x1xi32>
    %c8_i32 = arith.constant 8 : i32
    %7 = arith.muli %arg0, %c8_i32 : i32
    %c0_4 = arith.constant 0 : index
    %c0_5 = arith.constant 0 : index
    %8 = vector.load %arg5[%c0_4, %c0_5] : memref<8x128xf32, #tpu.memory_space<vmem>>, vector<8x128xf32>
    %c0_6 = arith.constant 0 : index
    %c0_7 = arith.constant 0 : index
    %9 = vector.load %arg6[%c0_6, %c0_7] : memref<8x128xf32, #tpu.memory_space<vmem>>, vector<8x128xf32>
    %c0_8 = arith.constant 0 : index
    %c0_9 = arith.constant 0 : index
    %10 = vector.load %arg4[%c0_8, %c0_9] : memref<8x128xf32, #tpu.memory_space<vmem>>, vector<8x128xf32>
    %c0_i32_10 = arith.constant 0 : i32
    %11 = arith.index_cast %c0_i32_10 : i32 to index
    %c0_11 = arith.constant 0 : index
    %c0_12 = arith.constant 0 : index
    %12 = vector.load %arg1[%11, %c0_11, %c0_12] : memref<8x8x512xf32, #tpu.memory_space<vmem>>, vector<1x8x512xf32>
    %13 = vector.shape_cast %12 : vector<1x8x512xf32> to vector<8x512xf32>
    %cst = arith.constant dense<0.000000e+00> : vector<8x512xf32>
    %14 = tpu.matmul %8, %3, %cst {dimension_numbers = #tpu.dot_dimension_numbers<[1], [0], [0], [1], [0, 0, 1, 1], [], []>} : vector<8x128xf32>, vector<128x512xf32>, vector<8x512xf32> -> vector<8x512xf32>
    %15 = arith.addf %13, %14 : vector<8x512xf32>
    %16 = vector.extract_strided_slice %15 {offsets = [0, 0], sizes = [8, 128], strides = [1, 1]} : vector<8x512xf32> to vector<8x128xf32>
    %17 = arith.negf %16 : vector<8x128xf32>
    %18 = math.exp %17 : vector<8x128xf32>
    %cst_13 = arith.constant 1.000000e+00 : f32
    %19 = vector.broadcast %cst_13 : f32 to vector<8x128xf32>
    %20 = arith.addf %19, %18 : vector<8x128xf32>
    %21 = arith.divf %19, %20 : vector<8x128xf32>
    %22 = vector.extract_strided_slice %15 {offsets = [0, 128], sizes = [8, 128], strides = [1, 1]} : vector<8x512xf32> to vector<8x128xf32>
    %23 = arith.negf %22 : vector<8x128xf32>
    %24 = math.exp %23 : vector<8x128xf32>
    %cst_14 = arith.constant 1.000000e+00 : f32
    %25 = vector.broadcast %cst_14 : f32 to vector<8x128xf32>
    %26 = arith.addf %25, %24 : vector<8x128xf32>
    %27 = arith.divf %25, %26 : vector<8x128xf32>
    %28 = vector.extract_strided_slice %15 {offsets = [0, 256], sizes = [8, 128], strides = [1, 1]} : vector<8x512xf32> to vector<8x128xf32>
    %29 = math.tanh %28 : vector<8x128xf32>
    %30 = vector.extract_strided_slice %15 {offsets = [0, 384], sizes = [8, 128], strides = [1, 1]} : vector<8x512xf32> to vector<8x128xf32>
    %31 = arith.negf %30 : vector<8x128xf32>
    %32 = math.exp %31 : vector<8x128xf32>
    %cst_15 = arith.constant 1.000000e+00 : f32
    %33 = vector.broadcast %cst_15 : f32 to vector<8x128xf32>
    %34 = arith.addf %33, %32 : vector<8x128xf32>
    %35 = arith.divf %33, %34 : vector<8x128xf32>
    %36 = arith.mulf %27, %9 : vector<8x128xf32>
    %37 = arith.mulf %21, %29 : vector<8x128xf32>
    %38 = arith.addf %36, %37 : vector<8x128xf32>
    %39 = math.tanh %38 : vector<8x128xf32>
    %40 = arith.mulf %35, %39 : vector<8x128xf32>
    %41 = arith.addi %7, %c0_i32_10 : i32
    %42 = vector.broadcast %41 : i32 to vector<8x1xi32>
    %43 = arith.cmpi eq, %6, %42 : vector<8x1xi32>
    %44 = vector.shape_cast %43 : vector<8x1xi1> to vector<8x1xi1>
    %45 = vector.broadcast %44 : vector<8x1xi1> to vector<8x128xi1>
    %46 = arith.select %45, %40, %10 : vector<8x128xi1>, vector<8x128xf32>
    %c1_i32_16 = arith.constant 1 : i32
    %47 = arith.index_cast %c1_i32_16 : i32 to index
    %c0_17 = arith.constant 0 : index
    %c0_18 = arith.constant 0 : index
    %48 = vector.load %arg1[%47, %c0_17, %c0_18] : memref<8x8x512xf32, #tpu.memory_space<vmem>>, vector<1x8x512xf32>
    %49 = vector.shape_cast %48 : vector<1x8x512xf32> to vector<8x512xf32>
    %cst_19 = arith.constant dense<0.000000e+00> : vector<8x512xf32>
    %50 = tpu.matmul %40, %3, %cst_19 {dimension_numbers = #tpu.dot_dimension_numbers<[1], [0], [0], [1], [0, 0, 1, 1], [], []>} : vector<8x128xf32>, vector<128x512xf32>, vector<8x512xf32> -> vector<8x512xf32>
    %51 = arith.addf %49, %50 : vector<8x512xf32>
    %52 = vector.extract_strided_slice %51 {offsets = [0, 0], sizes = [8, 128], strides = [1, 1]} : vector<8x512xf32> to vector<8x128xf32>
    %53 = arith.negf %52 : vector<8x128xf32>
    %54 = math.exp %53 : vector<8x128xf32>
    %cst_20 = arith.constant 1.000000e+00 : f32
    %55 = vector.broadcast %cst_20 : f32 to vector<8x128xf32>
    %56 = arith.addf %55, %54 : vector<8x128xf32>
    %57 = arith.divf %55, %56 : vector<8x128xf32>
    %58 = vector.extract_strided_slice %51 {offsets = [0, 128], sizes = [8, 128], strides = [1, 1]} : vector<8x512xf32> to vector<8x128xf32>
    %59 = arith.negf %58 : vector<8x128xf32>
    %60 = math.exp %59 : vector<8x128xf32>
    %cst_21 = arith.constant 1.000000e+00 : f32
    %61 = vector.broadcast %cst_21 : f32 to vector<8x128xf32>
    %62 = arith.addf %61, %60 : vector<8x128xf32>
    %63 = arith.divf %61, %62 : vector<8x128xf32>
    %64 = vector.extract_strided_slice %51 {offsets = [0, 256], sizes = [8, 128], strides = [1, 1]} : vector<8x512xf32> to vector<8x128xf32>
    %65 = math.tanh %64 : vector<8x128xf32>
    %66 = vector.extract_strided_slice %51 {offsets = [0, 384], sizes = [8, 128], strides = [1, 1]} : vector<8x512xf32> to vector<8x128xf32>
    %67 = arith.negf %66 : vector<8x128xf32>
    %68 = math.exp %67 : vector<8x128xf32>
    %cst_22 = arith.constant 1.000000e+00 : f32
    %69 = vector.broadcast %cst_22 : f32 to vector<8x128xf32>
    %70 = arith.addf %69, %68 : vector<8x128xf32>
    %71 = arith.divf %69, %70 : vector<8x128xf32>
    %72 = arith.mulf %63, %38 : vector<8x128xf32>
    %73 = arith.mulf %57, %65 : vector<8x128xf32>
    %74 = arith.addf %72, %73 : vector<8x128xf32>
    %75 = math.tanh %74 : vector<8x128xf32>
    %76 = arith.mulf %71, %75 : vector<8x128xf32>
    %77 = arith.addi %7, %c1_i32_16 : i32
    %78 = vector.broadcast %77 : i32 to vector<8x1xi32>
    %79 = arith.cmpi eq, %6, %78 : vector<8x1xi32>
    %80 = vector.shape_cast %79 : vector<8x1xi1> to vector<8x1xi1>
    %81 = vector.broadcast %80 : vector<8x1xi1> to vector<8x128xi1>
    %82 = arith.select %81, %76, %46 : vector<8x128xi1>, vector<8x128xf32>
    %c2_i32 = arith.constant 2 : i32
    %83 = arith.index_cast %c2_i32 : i32 to index
    %c0_23 = arith.constant 0 : index
    %c0_24 = arith.constant 0 : index
    %84 = vector.load %arg1[%83, %c0_23, %c0_24] : memref<8x8x512xf32, #tpu.memory_space<vmem>>, vector<1x8x512xf32>
    %85 = vector.shape_cast %84 : vector<1x8x512xf32> to vector<8x512xf32>
    %cst_25 = arith.constant dense<0.000000e+00> : vector<8x512xf32>
    %86 = tpu.matmul %76, %3, %cst_25 {dimension_numbers = #tpu.dot_dimension_numbers<[1], [0], [0], [1], [0, 0, 1, 1], [], []>} : vector<8x128xf32>, vector<128x512xf32>, vector<8x512xf32> -> vector<8x512xf32>
    %87 = arith.addf %85, %86 : vector<8x512xf32>
    %88 = vector.extract_strided_slice %87 {offsets = [0, 0], sizes = [8, 128], strides = [1, 1]} : vector<8x512xf32> to vector<8x128xf32>
    %89 = arith.negf %88 : vector<8x128xf32>
    %90 = math.exp %89 : vector<8x128xf32>
    %cst_26 = arith.constant 1.000000e+00 : f32
    %91 = vector.broadcast %cst_26 : f32 to vector<8x128xf32>
    %92 = arith.addf %91, %90 : vector<8x128xf32>
    %93 = arith.divf %91, %92 : vector<8x128xf32>
    %94 = vector.extract_strided_slice %87 {offsets = [0, 128], sizes = [8, 128], strides = [1, 1]} : vector<8x512xf32> to vector<8x128xf32>
    %95 = arith.negf %94 : vector<8x128xf32>
    %96 = math.exp %95 : vector<8x128xf32>
    %cst_27 = arith.constant 1.000000e+00 : f32
    %97 = vector.broadcast %cst_27 : f32 to vector<8x128xf32>
    %98 = arith.addf %97, %96 : vector<8x128xf32>
    %99 = arith.divf %97, %98 : vector<8x128xf32>
    %100 = vector.extract_strided_slice %87 {offsets = [0, 256], sizes = [8, 128], strides = [1, 1]} : vector<8x512xf32> to vector<8x128xf32>
    %101 = math.tanh %100 : vector<8x128xf32>
    %102 = vector.extract_strided_slice %87 {offsets = [0, 384], sizes = [8, 128], strides = [1, 1]} : vector<8x512xf32> to vector<8x128xf32>
    %103 = arith.negf %102 : vector<8x128xf32>
    %104 = math.exp %103 : vector<8x128xf32>
    %cst_28 = arith.constant 1.000000e+00 : f32
    %105 = vector.broadcast %cst_28 : f32 to vector<8x128xf32>
    %106 = arith.addf %105, %104 : vector<8x128xf32>
    %107 = arith.divf %105, %106 : vector<8x128xf32>
    %108 = arith.mulf %99, %74 : vector<8x128xf32>
    %109 = arith.mulf %93, %101 : vector<8x128xf32>
    %110 = arith.addf %108, %109 : vector<8x128xf32>
    %111 = math.tanh %110 : vector<8x128xf32>
    %112 = arith.mulf %107, %111 : vector<8x128xf32>
    %113 = arith.addi %7, %c2_i32 : i32
    %114 = vector.broadcast %113 : i32 to vector<8x1xi32>
    %115 = arith.cmpi eq, %6, %114 : vector<8x1xi32>
    %116 = vector.shape_cast %115 : vector<8x1xi1> to vector<8x1xi1>
    %117 = vector.broadcast %116 : vector<8x1xi1> to vector<8x128xi1>
    %118 = arith.select %117, %112, %82 : vector<8x128xi1>, vector<8x128xf32>
    %c3_i32 = arith.constant 3 : i32
    %119 = arith.index_cast %c3_i32 : i32 to index
    %c0_29 = arith.constant 0 : index
    %c0_30 = arith.constant 0 : index
    %120 = vector.load %arg1[%119, %c0_29, %c0_30] : memref<8x8x512xf32, #tpu.memory_space<vmem>>, vector<1x8x512xf32>
    %121 = vector.shape_cast %120 : vector<1x8x512xf32> to vector<8x512xf32>
    %cst_31 = arith.constant dense<0.000000e+00> : vector<8x512xf32>
    %122 = tpu.matmul %112, %3, %cst_31 {dimension_numbers = #tpu.dot_dimension_numbers<[1], [0], [0], [1], [0, 0, 1, 1], [], []>} : vector<8x128xf32>, vector<128x512xf32>, vector<8x512xf32> -> vector<8x512xf32>
    %123 = arith.addf %121, %122 : vector<8x512xf32>
    %124 = vector.extract_strided_slice %123 {offsets = [0, 0], sizes = [8, 128], strides = [1, 1]} : vector<8x512xf32> to vector<8x128xf32>
    %125 = arith.negf %124 : vector<8x128xf32>
    %126 = math.exp %125 : vector<8x128xf32>
    %cst_32 = arith.constant 1.000000e+00 : f32
    %127 = vector.broadcast %cst_32 : f32 to vector<8x128xf32>
    %128 = arith.addf %127, %126 : vector<8x128xf32>
    %129 = arith.divf %127, %128 : vector<8x128xf32>
    %130 = vector.extract_strided_slice %123 {offsets = [0, 128], sizes = [8, 128], strides = [1, 1]} : vector<8x512xf32> to vector<8x128xf32>
    %131 = arith.negf %130 : vector<8x128xf32>
    %132 = math.exp %131 : vector<8x128xf32>
    %cst_33 = arith.constant 1.000000e+00 : f32
    %133 = vector.broadcast %cst_33 : f32 to vector<8x128xf32>
    %134 = arith.addf %133, %132 : vector<8x128xf32>
    %135 = arith.divf %133, %134 : vector<8x128xf32>
    %136 = vector.extract_strided_slice %123 {offsets = [0, 256], sizes = [8, 128], strides = [1, 1]} : vector<8x512xf32> to vector<8x128xf32>
    %137 = math.tanh %136 : vector<8x128xf32>
    %138 = vector.extract_strided_slice %123 {offsets = [0, 384], sizes = [8, 128], strides = [1, 1]} : vector<8x512xf32> to vector<8x128xf32>
    %139 = arith.negf %138 : vector<8x128xf32>
    %140 = math.exp %139 : vector<8x128xf32>
    %cst_34 = arith.constant 1.000000e+00 : f32
    %141 = vector.broadcast %cst_34 : f32 to vector<8x128xf32>
    %142 = arith.addf %141, %140 : vector<8x128xf32>
    %143 = arith.divf %141, %142 : vector<8x128xf32>
    %144 = arith.mulf %135, %110 : vector<8x128xf32>
    %145 = arith.mulf %129, %137 : vector<8x128xf32>
    %146 = arith.addf %144, %145 : vector<8x128xf32>
    %147 = math.tanh %146 : vector<8x128xf32>
    %148 = arith.mulf %143, %147 : vector<8x128xf32>
    %149 = arith.addi %7, %c3_i32 : i32
    %150 = vector.broadcast %149 : i32 to vector<8x1xi32>
    %151 = arith.cmpi eq, %6, %150 : vector<8x1xi32>
    %152 = vector.shape_cast %151 : vector<8x1xi1> to vector<8x1xi1>
    %153 = vector.broadcast %152 : vector<8x1xi1> to vector<8x128xi1>
    %154 = arith.select %153, %148, %118 : vector<8x128xi1>, vector<8x128xf32>
    %c4_i32 = arith.constant 4 : i32
    %155 = arith.index_cast %c4_i32 : i32 to index
    %c0_35 = arith.constant 0 : index
    %c0_36 = arith.constant 0 : index
    %156 = vector.load %arg1[%155, %c0_35, %c0_36] : memref<8x8x512xf32, #tpu.memory_space<vmem>>, vector<1x8x512xf32>
    %157 = vector.shape_cast %156 : vector<1x8x512xf32> to vector<8x512xf32>
    %cst_37 = arith.constant dense<0.000000e+00> : vector<8x512xf32>
    %158 = tpu.matmul %148, %3, %cst_37 {dimension_numbers = #tpu.dot_dimension_numbers<[1], [0], [0], [1], [0, 0, 1, 1], [], []>} : vector<8x128xf32>, vector<128x512xf32>, vector<8x512xf32> -> vector<8x512xf32>
    %159 = arith.addf %157, %158 : vector<8x512xf32>
    %160 = vector.extract_strided_slice %159 {offsets = [0, 0], sizes = [8, 128], strides = [1, 1]} : vector<8x512xf32> to vector<8x128xf32>
    %161 = arith.negf %160 : vector<8x128xf32>
    %162 = math.exp %161 : vector<8x128xf32>
    %cst_38 = arith.constant 1.000000e+00 : f32
    %163 = vector.broadcast %cst_38 : f32 to vector<8x128xf32>
    %164 = arith.addf %163, %162 : vector<8x128xf32>
    %165 = arith.divf %163, %164 : vector<8x128xf32>
    %166 = vector.extract_strided_slice %159 {offsets = [0, 128], sizes = [8, 128], strides = [1, 1]} : vector<8x512xf32> to vector<8x128xf32>
    %167 = arith.negf %166 : vector<8x128xf32>
    %168 = math.exp %167 : vector<8x128xf32>
    %cst_39 = arith.constant 1.000000e+00 : f32
    %169 = vector.broadcast %cst_39 : f32 to vector<8x128xf32>
    %170 = arith.addf %169, %168 : vector<8x128xf32>
    %171 = arith.divf %169, %170 : vector<8x128xf32>
    %172 = vector.extract_strided_slice %159 {offsets = [0, 256], sizes = [8, 128], strides = [1, 1]} : vector<8x512xf32> to vector<8x128xf32>
    %173 = math.tanh %172 : vector<8x128xf32>
    %174 = vector.extract_strided_slice %159 {offsets = [0, 384], sizes = [8, 128], strides = [1, 1]} : vector<8x512xf32> to vector<8x128xf32>
    %175 = arith.negf %174 : vector<8x128xf32>
    %176 = math.exp %175 : vector<8x128xf32>
    %cst_40 = arith.constant 1.000000e+00 : f32
    %177 = vector.broadcast %cst_40 : f32 to vector<8x128xf32>
    %178 = arith.addf %177, %176 : vector<8x128xf32>
    %179 = arith.divf %177, %178 : vector<8x128xf32>
    %180 = arith.mulf %171, %146 : vector<8x128xf32>
    %181 = arith.mulf %165, %173 : vector<8x128xf32>
    %182 = arith.addf %180, %181 : vector<8x128xf32>
    %183 = math.tanh %182 : vector<8x128xf32>
    %184 = arith.mulf %179, %183 : vector<8x128xf32>
    %185 = arith.addi %7, %c4_i32 : i32
    %186 = vector.broadcast %185 : i32 to vector<8x1xi32>
    %187 = arith.cmpi eq, %6, %186 : vector<8x1xi32>
    %188 = vector.shape_cast %187 : vector<8x1xi1> to vector<8x1xi1>
    %189 = vector.broadcast %188 : vector<8x1xi1> to vector<8x128xi1>
    %190 = arith.select %189, %184, %154 : vector<8x128xi1>, vector<8x128xf32>
    %c5_i32 = arith.constant 5 : i32
    %191 = arith.index_cast %c5_i32 : i32 to index
    %c0_41 = arith.constant 0 : index
    %c0_42 = arith.constant 0 : index
    %192 = vector.load %arg1[%191, %c0_41, %c0_42] : memref<8x8x512xf32, #tpu.memory_space<vmem>>, vector<1x8x512xf32>
    %193 = vector.shape_cast %192 : vector<1x8x512xf32> to vector<8x512xf32>
    %cst_43 = arith.constant dense<0.000000e+00> : vector<8x512xf32>
    %194 = tpu.matmul %184, %3, %cst_43 {dimension_numbers = #tpu.dot_dimension_numbers<[1], [0], [0], [1], [0, 0, 1, 1], [], []>} : vector<8x128xf32>, vector<128x512xf32>, vector<8x512xf32> -> vector<8x512xf32>
    %195 = arith.addf %193, %194 : vector<8x512xf32>
    %196 = vector.extract_strided_slice %195 {offsets = [0, 0], sizes = [8, 128], strides = [1, 1]} : vector<8x512xf32> to vector<8x128xf32>
    %197 = arith.negf %196 : vector<8x128xf32>
    %198 = math.exp %197 : vector<8x128xf32>
    %cst_44 = arith.constant 1.000000e+00 : f32
    %199 = vector.broadcast %cst_44 : f32 to vector<8x128xf32>
    %200 = arith.addf %199, %198 : vector<8x128xf32>
    %201 = arith.divf %199, %200 : vector<8x128xf32>
    %202 = vector.extract_strided_slice %195 {offsets = [0, 128], sizes = [8, 128], strides = [1, 1]} : vector<8x512xf32> to vector<8x128xf32>
    %203 = arith.negf %202 : vector<8x128xf32>
    %204 = math.exp %203 : vector<8x128xf32>
    %cst_45 = arith.constant 1.000000e+00 : f32
    %205 = vector.broadcast %cst_45 : f32 to vector<8x128xf32>
    %206 = arith.addf %205, %204 : vector<8x128xf32>
    %207 = arith.divf %205, %206 : vector<8x128xf32>
    %208 = vector.extract_strided_slice %195 {offsets = [0, 256], sizes = [8, 128], strides = [1, 1]} : vector<8x512xf32> to vector<8x128xf32>
    %209 = math.tanh %208 : vector<8x128xf32>
    %210 = vector.extract_strided_slice %195 {offsets = [0, 384], sizes = [8, 128], strides = [1, 1]} : vector<8x512xf32> to vector<8x128xf32>
    %211 = arith.negf %210 : vector<8x128xf32>
    %212 = math.exp %211 : vector<8x128xf32>
    %cst_46 = arith.constant 1.000000e+00 : f32
    %213 = vector.broadcast %cst_46 : f32 to vector<8x128xf32>
    %214 = arith.addf %213, %212 : vector<8x128xf32>
    %215 = arith.divf %213, %214 : vector<8x128xf32>
    %216 = arith.mulf %207, %182 : vector<8x128xf32>
    %217 = arith.mulf %201, %209 : vector<8x128xf32>
    %218 = arith.addf %216, %217 : vector<8x128xf32>
    %219 = math.tanh %218 : vector<8x128xf32>
    %220 = arith.mulf %215, %219 : vector<8x128xf32>
    %221 = arith.addi %7, %c5_i32 : i32
    %222 = vector.broadcast %221 : i32 to vector<8x1xi32>
    %223 = arith.cmpi eq, %6, %222 : vector<8x1xi32>
    %224 = vector.shape_cast %223 : vector<8x1xi1> to vector<8x1xi1>
    %225 = vector.broadcast %224 : vector<8x1xi1> to vector<8x128xi1>
    %226 = arith.select %225, %220, %190 : vector<8x128xi1>, vector<8x128xf32>
    %c6_i32 = arith.constant 6 : i32
    %227 = arith.index_cast %c6_i32 : i32 to index
    %c0_47 = arith.constant 0 : index
    %c0_48 = arith.constant 0 : index
    %228 = vector.load %arg1[%227, %c0_47, %c0_48] : memref<8x8x512xf32, #tpu.memory_space<vmem>>, vector<1x8x512xf32>
    %229 = vector.shape_cast %228 : vector<1x8x512xf32> to vector<8x512xf32>
    %cst_49 = arith.constant dense<0.000000e+00> : vector<8x512xf32>
    %230 = tpu.matmul %220, %3, %cst_49 {dimension_numbers = #tpu.dot_dimension_numbers<[1], [0], [0], [1], [0, 0, 1, 1], [], []>} : vector<8x128xf32>, vector<128x512xf32>, vector<8x512xf32> -> vector<8x512xf32>
    %231 = arith.addf %229, %230 : vector<8x512xf32>
    %232 = vector.extract_strided_slice %231 {offsets = [0, 0], sizes = [8, 128], strides = [1, 1]} : vector<8x512xf32> to vector<8x128xf32>
    %233 = arith.negf %232 : vector<8x128xf32>
    %234 = math.exp %233 : vector<8x128xf32>
    %cst_50 = arith.constant 1.000000e+00 : f32
    %235 = vector.broadcast %cst_50 : f32 to vector<8x128xf32>
    %236 = arith.addf %235, %234 : vector<8x128xf32>
    %237 = arith.divf %235, %236 : vector<8x128xf32>
    %238 = vector.extract_strided_slice %231 {offsets = [0, 128], sizes = [8, 128], strides = [1, 1]} : vector<8x512xf32> to vector<8x128xf32>
    %239 = arith.negf %238 : vector<8x128xf32>
    %240 = math.exp %239 : vector<8x128xf32>
    %cst_51 = arith.constant 1.000000e+00 : f32
    %241 = vector.broadcast %cst_51 : f32 to vector<8x128xf32>
    %242 = arith.addf %241, %240 : vector<8x128xf32>
    %243 = arith.divf %241, %242 : vector<8x128xf32>
    %244 = vector.extract_strided_slice %231 {offsets = [0, 256], sizes = [8, 128], strides = [1, 1]} : vector<8x512xf32> to vector<8x128xf32>
    %245 = math.tanh %244 : vector<8x128xf32>
    %246 = vector.extract_strided_slice %231 {offsets = [0, 384], sizes = [8, 128], strides = [1, 1]} : vector<8x512xf32> to vector<8x128xf32>
    %247 = arith.negf %246 : vector<8x128xf32>
    %248 = math.exp %247 : vector<8x128xf32>
    %cst_52 = arith.constant 1.000000e+00 : f32
    %249 = vector.broadcast %cst_52 : f32 to vector<8x128xf32>
    %250 = arith.addf %249, %248 : vector<8x128xf32>
    %251 = arith.divf %249, %250 : vector<8x128xf32>
    %252 = arith.mulf %243, %218 : vector<8x128xf32>
    %253 = arith.mulf %237, %245 : vector<8x128xf32>
    %254 = arith.addf %252, %253 : vector<8x128xf32>
    %255 = math.tanh %254 : vector<8x128xf32>
    %256 = arith.mulf %251, %255 : vector<8x128xf32>
    %257 = arith.addi %7, %c6_i32 : i32
    %258 = vector.broadcast %257 : i32 to vector<8x1xi32>
    %259 = arith.cmpi eq, %6, %258 : vector<8x1xi32>
    %260 = vector.shape_cast %259 : vector<8x1xi1> to vector<8x1xi1>
    %261 = vector.broadcast %260 : vector<8x1xi1> to vector<8x128xi1>
    %262 = arith.select %261, %256, %226 : vector<8x128xi1>, vector<8x128xf32>
    %c7_i32 = arith.constant 7 : i32
    %263 = arith.index_cast %c7_i32 : i32 to index
    %c0_53 = arith.constant 0 : index
    %c0_54 = arith.constant 0 : index
    %264 = vector.load %arg1[%263, %c0_53, %c0_54] : memref<8x8x512xf32, #tpu.memory_space<vmem>>, vector<1x8x512xf32>
    %265 = vector.shape_cast %264 : vector<1x8x512xf32> to vector<8x512xf32>
    %cst_55 = arith.constant dense<0.000000e+00> : vector<8x512xf32>
    %266 = tpu.matmul %256, %3, %cst_55 {dimension_numbers = #tpu.dot_dimension_numbers<[1], [0], [0], [1], [0, 0, 1, 1], [], []>} : vector<8x128xf32>, vector<128x512xf32>, vector<8x512xf32> -> vector<8x512xf32>
    %267 = arith.addf %265, %266 : vector<8x512xf32>
    %268 = vector.extract_strided_slice %267 {offsets = [0, 0], sizes = [8, 128], strides = [1, 1]} : vector<8x512xf32> to vector<8x128xf32>
    %269 = arith.negf %268 : vector<8x128xf32>
    %270 = math.exp %269 : vector<8x128xf32>
    %cst_56 = arith.constant 1.000000e+00 : f32
    %271 = vector.broadcast %cst_56 : f32 to vector<8x128xf32>
    %272 = arith.addf %271, %270 : vector<8x128xf32>
    %273 = arith.divf %271, %272 : vector<8x128xf32>
    %274 = vector.extract_strided_slice %267 {offsets = [0, 128], sizes = [8, 128], strides = [1, 1]} : vector<8x512xf32> to vector<8x128xf32>
    %275 = arith.negf %274 : vector<8x128xf32>
    %276 = math.exp %275 : vector<8x128xf32>
    %cst_57 = arith.constant 1.000000e+00 : f32
    %277 = vector.broadcast %cst_57 : f32 to vector<8x128xf32>
    %278 = arith.addf %277, %276 : vector<8x128xf32>
    %279 = arith.divf %277, %278 : vector<8x128xf32>
    %280 = vector.extract_strided_slice %267 {offsets = [0, 256], sizes = [8, 128], strides = [1, 1]} : vector<8x512xf32> to vector<8x128xf32>
    %281 = math.tanh %280 : vector<8x128xf32>
    %282 = vector.extract_strided_slice %267 {offsets = [0, 384], sizes = [8, 128], strides = [1, 1]} : vector<8x512xf32> to vector<8x128xf32>
    %283 = arith.negf %282 : vector<8x128xf32>
    %284 = math.exp %283 : vector<8x128xf32>
    %cst_58 = arith.constant 1.000000e+00 : f32
    %285 = vector.broadcast %cst_58 : f32 to vector<8x128xf32>
    %286 = arith.addf %285, %284 : vector<8x128xf32>
    %287 = arith.divf %285, %286 : vector<8x128xf32>
    %288 = arith.mulf %279, %254 : vector<8x128xf32>
    %289 = arith.mulf %273, %281 : vector<8x128xf32>
    %290 = arith.addf %288, %289 : vector<8x128xf32>
    %291 = math.tanh %290 : vector<8x128xf32>
    %292 = arith.mulf %287, %291 : vector<8x128xf32>
    %293 = arith.addi %7, %c7_i32 : i32
    %294 = vector.broadcast %293 : i32 to vector<8x1xi32>
    %295 = arith.cmpi eq, %6, %294 : vector<8x1xi32>
    %296 = vector.shape_cast %295 : vector<8x1xi1> to vector<8x1xi1>
    %297 = vector.broadcast %296 : vector<8x1xi1> to vector<8x128xi1>
    %298 = arith.select %297, %292, %262 : vector<8x128xi1>, vector<8x128xf32>
    %c8_i32_59 = arith.constant 8 : i32
    %c0_60 = arith.constant 0 : index
    %c0_61 = arith.constant 0 : index
    %299 = vector.load %arg5[%c0_60, %c0_61] : memref<8x128xf32, #tpu.memory_space<vmem>>, vector<8x128xf32>
    tpu.vector_store %arg5[%c0_60, %c0_61], %292 {strides = array<i32>} : memref<8x128xf32, #tpu.memory_space<vmem>>, vector<8x128xf32>,
    %c0_62 = arith.constant 0 : index
    %c0_63 = arith.constant 0 : index
    %300 = vector.load %arg6[%c0_62, %c0_63] : memref<8x128xf32, #tpu.memory_space<vmem>>, vector<8x128xf32>
    tpu.vector_store %arg6[%c0_62, %c0_63], %290 {strides = array<i32>} : memref<8x128xf32, #tpu.memory_space<vmem>>, vector<8x128xf32>,
    %c0_64 = arith.constant 0 : index
    %c0_65 = arith.constant 0 : index
    %301 = vector.load %arg4[%c0_64, %c0_65] : memref<8x128xf32, #tpu.memory_space<vmem>>, vector<8x128xf32>
    tpu.vector_store %arg4[%c0_64, %c0_65], %298 {strides = array<i32>} : memref<8x128xf32, #tpu.memory_space<vmem>>, vector<8x128xf32>,
    return
  }
  func.func @transform_0(%arg0: i32) -> (i32, i32, i32) {
    %c0_i32 = arith.constant 0 : i32
    %c0_i32_0 = arith.constant 0 : i32
    %c0_i32_1 = arith.constant 0 : i32
    return %arg0, %c0_i32, %c0_i32_0 : i32, i32, i32
  }
  func.func @transform_1(%arg0: i32) -> (i32, i32) {
    %c0_i32 = arith.constant 0 : i32
    %c0_i32_0 = arith.constant 0 : i32
    %c0_i32_1 = arith.constant 0 : i32
    return %c0_i32, %c0_i32_0 : i32, i32
  }
  func.func @transform_2(%arg0: i32) -> (i32, i32) {
    %c0_i32 = arith.constant 0 : i32
    %c0_i32_0 = arith.constant 0 : i32
    %c0_i32_1 = arith.constant 0 : i32
    return %c0_i32, %c0_i32_0 : i32, i32
  }
  func.func @transform_3(%arg0: i32) -> (i32, i32) {
    %c0_i32 = arith.constant 0 : i32
    %c0_i32_0 = arith.constant 0 : i32
    %c0_i32_1 = arith.constant 0 : i32
    return %c0_i32, %c0_i32_0 : i32, i32
  }
}

</mosaic_0001>

<bundles_post_ra>
// kernel: tpu_custom_call.1
= control target key start
LH: loop header
LB: loop body
LE: loop exit
PB: predicated region body
PF: predicated region fallthrough
CT: control target
= control target key end

     0   :  { %8 = vsyncpa [#allocation5], 0  ;;  %s2617_s0 = inlined_call_operand.hbm [shape: f32[8,8,512], index: 0, kind: input, shape index: {}]   ;;  %s2618_s1 = inlined_call_operand.vmem [shape: s32[8,1], index: 1, kind: input, shape index: {}]   ;;  %s2619_s2 = inlined_call_operand.hbm [shape: f32[128,512], index: 2, kind: input, shape index: {}]   ;;  %s2620_s3 = inlined_call_operand.hbm [shape: f32[8,128], index: 3, kind: output, shape index: {}]  }
   0x1   :  { %9 = vsyncpa [#allocation8], 0 }
   0x2   :  { %10 = vsyncpa [#allocation6], 0  ;;  %s15_s14 = sshll.u32 %s2617_s0, 4  ;;  %s1736_s15 = smov [#allocation4]   ;;  %s16_s14 = int_to_ptr.hbm [resolvable:$true] %s15_s14 }
   0x3   :  { %s17_s16 = sshll.u32 %s1736_s15, 4  ;;  %s30_s19 = sshll.u32 %s2619_s2, 4  ;;  %s18_s16 = int_to_ptr.vmem [resolvable:$true] %s17_s16  ;;  %s31_s19 = int_to_ptr.hbm [resolvable:$true] %s30_s19 }
   0x4   :  { %s1737_s20 = smov 512   ;;  %s1738_s21 = smov 32  }
   0x5   :  { %23 = dma.hbm_to_vmem [thread:$0]  %s16_s14, 4096, %s18_s16, [#allocation5], %s1737_s20, %s1737_s20, %s1738_s21  }
   0x6   :  { %s1739_s22 = smov [#allocation7]  }
   0x7   :  { %s32_s23 = sshll.u32 %s1739_s22, 4  ;;  %s33_s23 = int_to_ptr.vmem [resolvable:$true] %s32_s23 }
   0x8   :  { %38 = dma.hbm_to_vmem [thread:$0]  %s31_s19, 8192, %s33_s23, [#allocation8], %s1737_s20, %s1737_s20, %s1738_s21  }
   0x9   :  { %1730 = dma.done.wait [#allocation5], 4096  }
   0xa   :  { %1731 = vsyncadd [#allocation5], 4294963200 }
   0xb   :  { %1732 = dma.done.wait [#allocation8], 8192  }
   0xc   :  { %1733 = vsyncadd [#allocation8], 4294959104  ;;  %v1769_v0 = vld [vmem:[#allocation7 + $0x1e0] sm:$0xff]  ;;  %v1771_v1 = vld [vmem:[#allocation7 + $0x1e8] sm:$0xff]  ;;  %v1740_v62 = vmov 0.0   ;;  %v2627_v63 = vmov 0  }
   0xd   :  { %v1773_v2 = vld [vmem:[#allocation7 + $0x1f8] sm:$0xff]  ;;  %128 = vmatpush.msra.mxu0 %v1769_v0  ;;  %148 = vmatpush.msra.mxu1 %v1771_v1  ;;  %v1777_v3 = vld [vmem:[#allocation7 + $0x1c0] sm:$0xff]  ;;  %v1779_v4 = vld [vmem:[#allocation7 + $0x1c8] sm:$0xff]  ;;  %s1420_s27 = sshll.u32 %s2620_s3, 4  ;;  %s1421_s27 = int_to_ptr.hbm [resolvable:$true] %s1420_s27 }
   0xe   :  { %v1781_v5 = vld [vmem:[#allocation7 + $0x1d8] sm:$0xff]  ;;  %188 = vmatpush.msra.mxu3 %v1773_v2  ;;  %v1784_v6 = vld [vmem:[#allocation7 + $0x1a0] sm:$0xff]  ;;  %v1786_v7 = vld [vmem:[#allocation7 + $0x1a8] sm:$0xff]  ;;  %1463 = vset.pattern.permute.xlu0 %v2627_v63 }
   0xf   :  { %129 = vmatpush.msra.mxu0 %v1777_v3  ;;  %149 = vmatpush.msra.mxu1 %v1779_v4  ;;  %v1790_v8 = vld [vmem:[#allocation7 + $0x1b8] sm:$0xff]  ;;  %v1793_v9 = vld [vmem:[#allocation7 + $0x180] sm:$0xff]  ;;  %v1795_v10 = vld [vmem:[#allocation7 + $0x188] sm:$0xff] }
  0x10   :  { %189 = vmatpush.msra.mxu3 %v1781_v5  ;;  %v1799_v11 = vld [vmem:[#allocation7 + $0x198] sm:$0xff]  ;;  %v1802_v12 = vld [vmem:[#allocation7 + $0x160] sm:$0xff]  ;;  %v1804_v13 = vld [vmem:[#allocation7 + $0x168] sm:$0xff] }
  0x11   :  { %130 = vmatpush.msra.mxu0 %v1784_v6  ;;  %150 = vmatpush.msra.mxu1 %v1786_v7  ;;  %v1808_v14 = vld [vmem:[#allocation7 + $0x178] sm:$0xff]  ;;  %v1811_v15 = vld [vmem:[#allocation7 + $0x140] sm:$0xff]  ;;  %v1813_v16 = vld [vmem:[#allocation7 + $0x148] sm:$0xff] }
  0x12   :  { %190 = vmatpush.msra.mxu3 %v1790_v8  ;;  %v1815_v17 = vld [vmem:[#allocation7 + $0x1f0] sm:$0xff]  ;;  %v1819_v18 = vld [vmem:[#allocation7 + $0x158] sm:$0xff]  ;;  %v1824_v20 = vld [vmem:[#allocation7 + $0x120] sm:$0xff] }
  0x13   :  { %131 = vmatpush.msra.mxu0 %v1793_v9  ;;  %151 = vmatpush.msra.mxu1 %v1795_v10  ;;  %v1821_v19 = vld [vmem:[#allocation7 + $0x1d0] sm:$0xff]  ;;  %v1826_v21 = vld [vmem:[#allocation7 + $0x128] sm:$0xff]  ;;  %v1831_v22 = vld [vmem:[#allocation7 + $0x138] sm:$0xff] }
  0x14   :  { %191 = vmatpush.msra.mxu3 %v1799_v11  ;;  %168 = vmatpush.msra.mxu2 %v1815_v17  ;;  %v1833_v23 = vld [vmem:[#allocation7 + $0x1b0] sm:$0xff]  ;;  %v1836_v24 = vld [vmem:[#allocation7 + $0x100] sm:$0xff]  ;;  %v1838_v25 = vld [vmem:[#allocation7 + $0x108] sm:$0xff] }
  0x15   :  { %132 = vmatpush.msra.mxu0 %v1802_v12  ;;  %152 = vmatpush.msra.mxu1 %v1804_v13  ;;  %v1843_v26 = vld [vmem:[#allocation7 + $0x118] sm:$0xff]  ;;  %v1845_v27 = vld [vmem:[#allocation7 + $0x190] sm:$0xff]  ;;  %v1848_v28 = vld [vmem:[#allocation7 + $0xe0] sm:$0xff] }
  0x16   :  { %192 = vmatpush.msra.mxu3 %v1808_v14  ;;  %169 = vmatpush.msra.mxu2 %v1821_v19  ;;  %v1850_v29 = vld [vmem:[#allocation7 + $0xe8] sm:$0xff]  ;;  %v1855_v30 = vld [vmem:[#allocation7 + $0xf8] sm:$0xff]  ;;  %v1857_v31 = vld [vmem:[#allocation7 + $0x170] sm:$0xff] }
  0x17   :  { %133 = vmatpush.msra.mxu0 %v1811_v15  ;;  %153 = vmatpush.msra.mxu1 %v1813_v16  ;;  %v1860_v32 = vld [vmem:[#allocation7 + $0xc0] sm:$0xff]  ;;  %v1862_v33 = vld [vmem:[#allocation7 + $0xc8] sm:$0xff]  ;;  %v1867_v34 = vld [vmem:[#allocation7 + $0xd8] sm:$0xff] }
  0x18   :  { %193 = vmatpush.msra.mxu3 %v1819_v18  ;;  %170 = vmatpush.msra.mxu2 %v1833_v23  ;;  %2737 = vst [vmem:[#allocation13_spill] sm:$0xff] %v1862_v33  ;;  %v1869_v35 = vld [vmem:[#allocation7 + $0x150] sm:$0xff]  ;;  %v1872_v36 = vld [vmem:[#allocation7 + $0xa0] sm:$0xff]  ;;  %v1874_v37 = vld [vmem:[#allocation7 + $0xa8] sm:$0xff] }
  0x19   :  { %134 = vmatpush.msra.mxu0 %v1824_v20  ;;  %154 = vmatpush.msra.mxu1 %v1826_v21  ;;  %2738 = vst [vmem:[#allocation14_spill] sm:$0xff] %v1867_v34  ;;  %v1879_v38 = vld [vmem:[#allocation7 + $0xb8] sm:$0xff]  ;;  %v1881_v39 = vld [vmem:[#allocation7 + $0x130] sm:$0xff]  ;;  %v1884_v40 = vld [vmem:[#allocation7 + $0x80] sm:$0xff] }
  0x1a   :  { %194 = vmatpush.msra.mxu3 %v1831_v22  ;;  %171 = vmatpush.msra.mxu2 %v1845_v27  ;;  %2739 = vst [vmem:[#allocation15_spill] sm:$0xff] %v1872_v36  ;;  %v1886_v41 = vld [vmem:[#allocation7 + $0x88] sm:$0xff]  ;;  %v1891_v42 = vld [vmem:[#allocation7 + $0x98] sm:$0xff]  ;;  %v1893_v43 = vld [vmem:[#allocation7 + $0x110] sm:$0xff] }
  0x1b   :  { %135 = vmatpush.msra.mxu0 %v1836_v24  ;;  %155 = vmatpush.msra.mxu1 %v1838_v25  ;;  %2740 = vst [vmem:[#allocation16_spill] sm:$0xff] %v1874_v37  ;;  %v1896_v44 = vld [vmem:[#allocation7 + $0x60] sm:$0xff]  ;;  %v1898_v45 = vld [vmem:[#allocation7 + $0x68] sm:$0xff]  ;;  %v1906_v47 = vld [vmem:[#allocation7 + $0x78] sm:$0xff] }
  0x1c   :  { %195 = vmatpush.msra.mxu3 %v1843_v26  ;;  %172 = vmatpush.msra.mxu2 %v1857_v31  ;;  %2741 = vst [vmem:[#allocation17_spill] sm:$0xff] %v1879_v38  ;;  %v118_v46 = vld [vmem:[%s2618_s1] sm:$0xff]  ;;  %v1908_v48 = vld [vmem:[#allocation7 + $0xf0] sm:$0xff]  ;;  %v1913_v50 = vld [vmem:[#allocation7 + $0x48] sm:$0xff]  ;;  %s1742_s1 = smov [#allocation9]  }
  0x1d   :  { %136 = vmatpush.msra.mxu0 %v1848_v28  ;;  %156 = vmatpush.msra.mxu1 %v1850_v29  ;;  %2742 = vst [vmem:[#allocation18_spill] sm:$0xff] %v1884_v40  ;;  %v1911_v49 = vld [vmem:[#allocation7 + $0x40] sm:$0xff]  ;;  %v1918_v51 = vld [vmem:[#allocation7 + $0x58] sm:$0xff]  ;;  %v1920_v52 = vld [vmem:[#allocation7 + $0xd0] sm:$0xff]  ;;  %v1922_v53 = vadd.s32 4294967295, %v118_v46  ;;  %s1418_s24 = sshll.u32 %s1742_s1, 4  ;;  %s1419_s24 = int_to_ptr.vmem [resolvable:$true] %s1418_s24 }
  0x1e   :  { %196 = vmatpush.msra.mxu3 %v1855_v30  ;;  %2743 = vst [vmem:[#allocation19_spill] sm:$0xff] %v1886_v41  ;;  %173 = vmatpush.msra.mxu2 %v1869_v35  ;;  %v1925_v54 = vld [vmem:[#allocation7 + $0x20] sm:$0xff]  ;;  %v1927_v55 = vld [vmem:[#allocation7 + $0x28] sm:$0xff]  ;;  %v1932_v56 = vld [vmem:[#allocation7 + $0x38] sm:$0xff] }
  0x1f   :  { %137 = vmatpush.msra.mxu0 %v1860_v32  ;;  %157 = vmatpush.msra.mxu1 %v1862_v33  ;;  %2744 = vst [vmem:[#allocation20_spill] sm:$0xff] %v1891_v42  ;;  %v1934_v57 = vld [vmem:[#allocation7 + $0xb0] sm:$0xff]  ;;  %v1937_v58 = vld [vmem:[#allocation7] sm:$0xff]  ;;  %v1939_v59 = vld [vmem:[#allocation7 + $0x8] sm:$0xff]  ;;  %vm276_vm0 = vcmp.eq.s32.totalorder %v1922_v53, 0 }
  0x20   :  { %197 = vmatpush.msra.mxu3 %v1867_v34  ;;  %2745 = vst [vmem:[#allocation21_spill] sm:$0xff] %v1896_v44  ;;  %174 = vmatpush.msra.mxu2 %v1881_v39  ;;  %v1944_v60 = vld [vmem:[#allocation7 + $0x18] sm:$0xff]  ;;  %v1951_v61 = vld [vmem:[#allocation7 + $0x90] sm:$0xff]  ;;  %v277_v46 = vsel %vm276_vm0, 1, %v2627_v63 }
  0x21   :  { %138 = vmatpush.msra.mxu0 %v1872_v36  ;;  %158 = vmatpush.msra.mxu1 %v1874_v37  ;;  %2746 = vst [vmem:[#allocation22_spill] sm:$0xff] %v1898_v45  ;;  %v1970_v63 = vld [vmem:[#allocation7 + $0x10] sm:$0xff] }
  0x22   :  { %198 = vmatpush.msra.mxu3 %v1879_v38  ;;  %2747 = vst [vmem:[#allocation23_spill] sm:$0xff] %v1906_v47  ;;  %175 = vmatpush.msra.mxu2 %v1893_v43 }
  0x23   :  { %139 = vmatpush.msra.mxu0 %v1884_v40  ;;  %159 = vmatpush.msra.mxu1 %v1886_v41  ;;  %2748 = vst [vmem:[#allocation24_spill] sm:$0xff] %v1911_v49 }
  0x24   :  { %199 = vmatpush.msra.mxu3 %v1891_v42  ;;  %2749 = vst [vmem:[#allocation25_spill] sm:$0xff] %v1913_v50  ;;  %176 = vmatpush.msra.mxu2 %v1908_v48 }
  0x25   :  { %140 = vmatpush.msra.mxu0 %v1896_v44  ;;  %160 = vmatpush.msra.mxu1 %v1898_v45  ;;  %2750 = vst [vmem:[#allocation26_spill] sm:$0xff] %v1918_v51 }
  0x26   :  { %2751 = vst [vmem:[#allocation27_spill] sm:$0xff] %v1920_v52  ;;  %200 = vmatpush.msra.mxu3 %v1906_v47  ;;  %177 = vmatpush.msra.mxu2 %v1920_v52 }
  0x27   :  { %2752 = vst [vmem:[#allocation28_spill] sm:$0xff] %v1922_v53  ;;  %141 = vmatpush.msra.mxu0 %v1911_v49  ;;  %161 = vmatpush.msra.mxu1 %v1913_v50  ;;  %v1955_v53 = vld [vmem:[#allocation7 + $0x70] sm:$0xff] }
  0x28   :  { %2753 = vst [vmem:[#allocation29_spill] sm:$0xff] %v1925_v54  ;;  %201 = vmatpush.msra.mxu3 %v1918_v51  ;;  %178 = vmatpush.msra.mxu2 %v1934_v57 }
  0x29   :  { %2754 = vst [vmem:[#allocation30_spill] sm:$0xff] %v1927_v55  ;;  %142 = vmatpush.msra.mxu0 %v1925_v54  ;;  %162 = vmatpush.msra.mxu1 %v1927_v55 }
  0x2a   :  { %2755 = vst [vmem:[#allocation31_spill] sm:$0xff] %v1932_v56  ;;  %202 = vmatpush.msra.mxu3 %v1932_v56  ;;  %179 = vmatpush.msra.mxu2 %v1951_v61 }
  0x2b   :  { %2756 = vst [vmem:[#allocation32_spill] sm:$0xff] %v1934_v57  ;;  %143 = vmatpush.msra.mxu0 %v1937_v58  ;;  %163 = vmatpush.msra.mxu1 %v1939_v59 }
  0x2c   :  { %2757 = vst [vmem:[#allocation33_spill] sm:$0xff] %v1937_v58  ;;  %203 = vmatpush.msra.mxu3 %v1944_v60  ;;  %144 = vmatmul.f32.vlgmr.msra.gmra.mxu0 %v1740_v62  ;;  %v1959_v58 = vld [vmem:[#allocation7 + $0x50] sm:$0xff] }
  0x2d   :  { %2758 = vst [vmem:[#allocation34_spill] sm:$0xff] %v1939_v59  ;;  %164 = vmatmul.f32.vlgmr.msra.gmra.mxu1 %v1740_v62  ;;  %204 = vmatmul.f32.vlgmr.msra.gmra.mxu3 %v1740_v62 }
  0x2e   :  { %2759 = vst [vmem:[#allocation35_spill] sm:$0xff] %v1944_v60  ;;  %279 = vperm.xlu0 %1463, %v277_v46   ;;  %288 = vmatpush.msrb.mxu0 %v1769_v0  ;;  %v1964_v60 = vld [vmem:[#allocation7 + $0x30] sm:$0xff] }
  0x2f   :  { %2760 = vst [vmem:[#allocation36_spill] sm:$0xff] %v1951_v61  ;;  %180 = vmatpush.msra.mxu2 %v1955_v53  ;;  %308 = vmatpush.msrb.mxu1 %v1771_v1 }
  0x30   :  { %2761 = vst [vmem:[#allocation37_spill] sm:$0xff] %v1955_v53  ;;  %348 = vmatpush.msrb.mxu3 %v1773_v2  ;;  %289 = vmatpush.msrb.mxu0 %v1777_v3 }
  0x31   :  { %2762 = vst [vmem:[#allocation38_spill] sm:$0xff] %v1959_v58  ;;  %181 = vmatpush.msra.mxu2 %v1959_v58  ;;  %309 = vmatpush.msrb.mxu1 %v1779_v4 }
  0x32   :  { %2763 = vst [vmem:[#allocation39_spill] sm:$0xff] %v1964_v60  ;;  %349 = vmatpush.msrb.mxu3 %v1781_v5  ;;  %290 = vmatpush.msrb.mxu0 %v1784_v6 }
  0x33   :  { %2764 = vst [vmem:[#allocation40_spill] sm:$0xff] %v1970_v63  ;;  %182 = vmatpush.msra.mxu2 %v1964_v60  ;;  %310 = vmatpush.msrb.mxu1 %v1786_v7 }
  0x34   :  { %350 = vmatpush.msrb.mxu3 %v1790_v8  ;;  %291 = vmatpush.msrb.mxu0 %v1793_v9 }
  0x35   :  { %183 = vmatpush.msra.mxu2 %v1970_v63  ;;  %311 = vmatpush.msrb.mxu1 %v1795_v10  ;;  %v2766_v46 = vld [vmem:[#allocation35_spill] sm:$0xff] }
  0x36   :  { %184 = vmatmul.f32.vlgmr.msra.gmra.mxu2 %v1740_v62  ;;  %351 = vmatpush.msrb.mxu3 %v1799_v11  ;;  %v2765_v62 = vld [vmem:[#allocation33_spill] sm:$0xff] }
  0x37   :  { %328 = vmatpush.msrb.mxu2 %v1815_v17  ;;  %292 = vmatpush.msrb.mxu0 %v1802_v12 }
  0x38   :  { %312 = vmatpush.msrb.mxu1 %v1804_v13  ;;  %352 = vmatpush.msrb.mxu3 %v1808_v14 }
  0x39   :  { %329 = vmatpush.msrb.mxu2 %v1821_v19  ;;  %293 = vmatpush.msrb.mxu0 %v1811_v15 }
  0x3a   :  { %313 = vmatpush.msrb.mxu1 %v1813_v16  ;;  %353 = vmatpush.msrb.mxu3 %v1819_v18 }
  0x3b   :  { %330 = vmatpush.msrb.mxu2 %v1833_v23  ;;  %294 = vmatpush.msrb.mxu0 %v1824_v20 }
  0x3c   :  { %314 = vmatpush.msrb.mxu1 %v1826_v21  ;;  %354 = vmatpush.msrb.mxu3 %v1831_v22 }
  0x3d   :  { %331 = vmatpush.msrb.mxu2 %v1845_v27  ;;  %295 = vmatpush.msrb.mxu0 %v1836_v24 }
  0x3e   :  { %315 = vmatpush.msrb.mxu1 %v1838_v25  ;;  %355 = vmatpush.msrb.mxu3 %v1843_v26 }
  0x3f   :  { %332 = vmatpush.msrb.mxu2 %v1857_v31  ;;  %296 = vmatpush.msrb.mxu0 %v1848_v28 }
  0x40   :  { %316 = vmatpush.msrb.mxu1 %v1850_v29  ;;  %356 = vmatpush.msrb.mxu3 %v1855_v30 }
  0x41   :  { %333 = vmatpush.msrb.mxu2 %v1869_v35  ;;  %297 = vmatpush.msrb.mxu0 %v1860_v32 }
  0x42   :  { %317 = vmatpush.msrb.mxu1 %v1862_v33  ;;  %357 = vmatpush.msrb.mxu3 %v1867_v34 }
  0x43   :  { %334 = vmatpush.msrb.mxu2 %v1881_v39  ;;  %298 = vmatpush.msrb.mxu0 %v1872_v36 }
  0x44   :  { %318 = vmatpush.msrb.mxu1 %v1874_v37  ;;  %358 = vmatpush.msrb.mxu3 %v1879_v38 }
  0x45   :  { %335 = vmatpush.msrb.mxu2 %v1893_v43  ;;  %299 = vmatpush.msrb.mxu0 %v1884_v40 }
  0x46   :  { %319 = vmatpush.msrb.mxu1 %v1886_v41  ;;  %359 = vmatpush.msrb.mxu3 %v1891_v42 }
  0x47   :  { %336 = vmatpush.msrb.mxu2 %v1908_v48  ;;  %300 = vmatpush.msrb.mxu0 %v1896_v44 }
  0x48   :  { %320 = vmatpush.msrb.mxu1 %v1898_v45  ;;  %360 = vmatpush.msrb.mxu3 %v1906_v47 }
  0x49   :  { %337 = vmatpush.msrb.mxu2 %v1920_v52  ;;  %301 = vmatpush.msrb.mxu0 %v1911_v49 }
  0x4a   :  { %321 = vmatpush.msrb.mxu1 %v1913_v50  ;;  %361 = vmatpush.msrb.mxu3 %v1918_v51 }
  0x4b   :  { %338 = vmatpush.msrb.mxu2 %v1934_v57  ;;  %302 = vmatpush.msrb.mxu0 %v1925_v54 }
  0x4c   :  { %322 = vmatpush.msrb.mxu1 %v1927_v55  ;;  %362 = vmatpush.msrb.mxu3 %v1932_v56 }
  0x4d   :  { %339 = vmatpush.msrb.mxu2 %v1951_v61  ;;  %303 = vmatpush.msrb.mxu0 %v2765_v62 }
  0x4e   :  { %323 = vmatpush.msrb.mxu1 %v1939_v59  ;;  %363 = vmatpush.msrb.mxu3 %v2766_v46 }
  0x4f   :  { %340 = vmatpush.msrb.mxu2 %v1955_v53  ;;  %449 = vmatpush.msra.mxu0 %v1769_v0 }
  0x50   :  { %469 = vmatpush.msra.mxu1 %v1771_v1  ;;  %509 = vmatpush.msra.mxu3 %v1773_v2 }
  0x51   :  { %341 = vmatpush.msrb.mxu2 %v1959_v58  ;;  %450 = vmatpush.msra.mxu0 %v1777_v3 }
  0x52   :  { %470 = vmatpush.msra.mxu1 %v1779_v4  ;;  %510 = vmatpush.msra.mxu3 %v1781_v5 }
  0x53   :  { %342 = vmatpush.msrb.mxu2 %v1964_v60  ;;  %451 = vmatpush.msra.mxu0 %v1784_v6 }
  0x54   :  { %471 = vmatpush.msra.mxu1 %v1786_v7  ;;  %511 = vmatpush.msra.mxu3 %v1790_v8 }
  0x55   :  { %343 = vmatpush.msrb.mxu2 %v1970_v63  ;;  %452 = vmatpush.msra.mxu0 %v1793_v9 }
  0x56   :  { %472 = vmatpush.msra.mxu1 %v1795_v10  ;;  %512 = vmatpush.msra.mxu3 %v1799_v11 }
  0x57   :  { %489 = vmatpush.msra.mxu2 %v1815_v17  ;;  %453 = vmatpush.msra.mxu0 %v1802_v12 }
  0x58   :  { %473 = vmatpush.msra.mxu1 %v1804_v13  ;;  %513 = vmatpush.msra.mxu3 %v1808_v14 }
  0x59   :  { %490 = vmatpush.msra.mxu2 %v1821_v19  ;;  %454 = vmatpush.msra.mxu0 %v1811_v15 }
  0x5a   :  { %474 = vmatpush.msra.mxu1 %v1813_v16  ;;  %514 = vmatpush.msra.mxu3 %v1819_v18 }
  0x5b   :  { %491 = vmatpush.msra.mxu2 %v1833_v23  ;;  %455 = vmatpush.msra.mxu0 %v1824_v20 }
  0x5c   :  { %475 = vmatpush.msra.mxu1 %v1826_v21  ;;  %515 = vmatpush.msra.mxu3 %v1831_v22 }
  0x5d   :  { %492 = vmatpush.msra.mxu2 %v1845_v27  ;;  %456 = vmatpush.msra.mxu0 %v1836_v24 }
  0x5e   :  { %476 = vmatpush.msra.mxu1 %v1838_v25  ;;  %516 = vmatpush.msra.mxu3 %v1843_v26 }
  0x5f   :  { %493 = vmatpush.msra.mxu2 %v1857_v31  ;;  %457 = vmatpush.msra.mxu0 %v1848_v28 }
  0x60   :  { %477 = vmatpush.msra.mxu1 %v1850_v29  ;;  %517 = vmatpush.msra.mxu3 %v1855_v30 }
  0x61   :  { %494 = vmatpush.msra.mxu2 %v1869_v35  ;;  %458 = vmatpush.msra.mxu0 %v1860_v32 }
  0x62   :  { %478 = vmatpush.msra.mxu1 %v1862_v33  ;;  %518 = vmatpush.msra.mxu3 %v1867_v34 }
  0x63   :  { %495 = vmatpush.msra.mxu2 %v1881_v39  ;;  %459 = vmatpush.msra.mxu0 %v1872_v36 }
  0x64   :  { %479 = vmatpush.msra.mxu1 %v1874_v37  ;;  %519 = vmatpush.msra.mxu3 %v1879_v38 }
  0x65   :  { %496 = vmatpush.msra.mxu2 %v1893_v43  ;;  %460 = vmatpush.msra.mxu0 %v1884_v40 }
  0x66   :  { %480 = vmatpush.msra.mxu1 %v1886_v41  ;;  %520 = vmatpush.msra.mxu3 %v1891_v42  ;;  %v2768_v41 = vld [vmem:[#allocation28_spill] sm:$0xff] }
  0x67   :  { %497 = vmatpush.msra.mxu2 %v1908_v48  ;;  %461 = vmatpush.msra.mxu0 %v1896_v44  ;;  %vm437_vm1 = vcmp.eq.s32.totalorder %v2768_v41, 1 }
  0x68   :  { %481 = vmatpush.msra.mxu1 %v1898_v45  ;;  %521 = vmatpush.msra.mxu3 %v1906_v47 }
  0x69   :  { %498 = vmatpush.msra.mxu2 %v1920_v52  ;;  %462 = vmatpush.msra.mxu0 %v1911_v49  ;;  %v2767_v49 = vmov 0  }
  0x6a   :  { %482 = vmatpush.msra.mxu1 %v1913_v50  ;;  %522 = vmatpush.msra.mxu3 %v1918_v51 }
  0x6b   :  { %499 = vmatpush.msra.mxu2 %v1934_v57  ;;  %463 = vmatpush.msra.mxu0 %v1925_v54 }
  0x6c   :  { %483 = vmatpush.msra.mxu1 %v1927_v55  ;;  %523 = vmatpush.msra.mxu3 %v1932_v56  ;;  %v124_v55 = vld [vmem:[#allocation4] sm:$0xff]  ;;  %v125_v56 = vld [vmem:[#allocation4 + $0x8] sm:$0xff] }
  0x6d   :  { %500 = vmatpush.msra.mxu2 %v1951_v61  ;;  %464 = vmatpush.msra.mxu0 %v2765_v62 }
  0x6e   :  { %484 = vmatpush.msra.mxu1 %v1939_v59  ;;  %524 = vmatpush.msra.mxu3 %v2766_v46  ;;  %v127_v46 = vld [vmem:[#allocation4 + $0x18] sm:$0xff] }
  0x6f   :  { %501 = vmatpush.msra.mxu2 %v1955_v53  ;;  %1464 = vset.pattern.permute.xlu1 %v2767_v49 }
  0x70   :  { %1465 = vset.pattern.permute.xlu2 %v2767_v49 }
  0x71   :  { %502 = vmatpush.msra.mxu2 %v1959_v58 }
  0x73   :  { %503 = vmatpush.msra.mxu2 %v1964_v60 }
  0x75   :  { %504 = vmatpush.msra.mxu2 %v1970_v63  ;;  %v126_v63 = vld [vmem:[#allocation4 + $0x10] sm:$0xff] }
  0xa9   :  { %v145_v54 = vpop.f32.mrf.mxu0 }
  0xaa   :  { %v208_v62 = vadd.f32 %v145_v54, %v124_v55  ;;  %v165_v51 = vpop.f32.mrf.mxu1 }
  0xab   :  { %v209_v50 = vadd.f32 %v165_v51, %v125_v56  ;;  %v438_v51 = vsel %vm437_vm1, 1, %v2767_v49 }
  0xac   :  { %v1432_v47 = vmul.f32 -1.442695, %v208_v62  ;;  %440 = vperm.xlu0 %1463, %v438_v51  }
  0xad   :  { %v1433_v59 = vmul.f32 -1.442695, %v209_v50 }
  0xae   :  { %1466 = vpow2.f32 %v1432_v47 }
  0xaf   :  { %1468 = vpow2.f32 %v1433_v59 }
  0xb0   :  { %v205_v53 = vpop.f32.mrf.mxu3 }
  0xb1   :  { %v211_v45 = vadd.f32 %v205_v53, %v127_v46 }
  0xb3   :  { %v1434_v58 = vmul.f32 -1.442695, %v211_v45 }
  0xb4   :  { %v1467_v44 = vpop.eup %1466 }
  0xb5   :  { %v1469_v42 = vpop.eup %1468  ;;  %v215_v61 = vadd.f32 1.0, %v1467_v44  ;;  %1470 = vpow2.f32 %v1434_v58 }
  0xb6   :  { %v234_v60 = vadd.f32 1.0, %v1469_v42 }
  0xb7   :  { %1472 = vrcp.f32 %v215_v61  ;;  %v227_v58 = vand.u32 2147483648, %v215_v61  ;;  %v225_v41 = vand.u32 2147483647, %v215_v61  ;;  %vm221_vm4 = vweird.f32 %v215_v61 }
  0xb8   :  { %1474 = vrcp.f32 %v234_v60  ;;  %v246_v62 = vand.u32 2147483648, %v234_v60  ;;  %v244_v49 = vand.u32 2147483647, %v234_v60  ;;  %vm240_vm5 = vweird.f32 %v234_v60 }
  0xb9   :  { %v185_v54 = vpop.f32.mrf.mxu2  ;;  %vm226_vm7 = vcmp.eq.f32.partialorder %v225_v41, 8.507059e+37 }
  0xba   :  { %v210_v47 = vadd.f32 %v185_v54, %v126_v63  ;;  %vm245_vm9 = vcmp.eq.f32.partialorder %v244_v49, 8.507059e+37 }
  0xbb   :  { %v1471_v50 = vpop.eup %1470 }
  0xbc   :  { %v254_v55 = vadd.f32 1.0, %v1471_v50  ;;  %v228_v50 = vor.u32 1.1754944e-38, %v227_v58 }
  0xbd   :  { %v1473_v56 = vpop.eup %1472 }
  0xbe   :  { %v1475_v53 = vpop.eup %1474  ;;  %v217_v45 = vmul.f32 %v1473_v56, %v215_v61  ;;  %1476 = vrcp.f32 %v254_v55  ;;  %vm222_vm2 = vweird.f32 %v1473_v56  ;;  %vm260_vm11 = vweird.f32 %v254_v55 }
  0xbf   :  { %v236_v59 = vmul.f32 %v1475_v53, %v234_v60  ;;  %1478 = vtanh.f32 %v210_v47  ;;  %vm241_vm3 = vweird.f32 %v1475_v53  ;;  %vm223_vm6 = vmor %vm221_vm4, %vm222_vm2  ;;  %v247_v47 = vor.u32 1.1754944e-38, %v246_v62  ;;  %v2776_v62 = vld [vmem:[#allocation19_spill] sm:$0xff] }
  0xc0   :  { %v218_v44 = vsub.f32 1.0, %v217_v45  ;;  %vm242_vm8 = vmor %vm240_vm5, %vm241_vm3  ;;  %v266_v60 = vand.u32 2147483648, %v254_v55 }
  0xc1   :  { %v237_v42 = vsub.f32 1.0, %v236_v59 }
  0xc2   :  { %v219_v46 = vmul.f32 %v1473_v56, %v218_v44 }
  0xc3   :  { %v238_v40 = vmul.f32 %v1475_v53, %v237_v42 }
  0xc4   :  { %v1477_v38 = vpop.eup %1476  ;;  %v220_v63 = vadd.f32 %v1473_v56, %v219_v46 }
  0xc5   :  { %v1479_v54 = vpop.eup %1478  ;;  %v256_v51 = vmul.f32 %v1477_v38, %v254_v55  ;;  %v239_v57 = vadd.f32 %v1475_v53, %v238_v40  ;;  %vm261_vm10 = vweird.f32 %v1477_v38  ;;  %v264_v40 = vand.u32 2147483647, %v254_v55  ;;  %v2774_v55 = vld [vmem:[#allocation17_spill] sm:$0xff] }
  0xc6   :  { %v224_v45 = vsel %vm223_vm6, %v1473_v56, %v220_v63  ;;  %vm262_vm12 = vmor %vm260_vm11, %vm261_vm10  ;;  %v267_v56 = vor.u32 1.1754944e-38, %v266_v60  ;;  %v2777_v63 = vld [vmem:[#allocation36_spill] sm:$0xff]  ;;  %v2787_v60 = vld [vmem:[#allocation29_spill] sm:$0xff] }
  0xc7   :  { %v257_v59 = vsub.f32 1.0, %v256_v51  ;;  %v229_v44 = vsel %vm226_vm7, %v228_v50, %v224_v45  ;;  %v243_v37 = vsel %vm242_vm8, %v1475_v53, %v239_v57  ;;  %vm265_vm13 = vcmp.eq.f32.partialorder %v264_v40, 8.507059e+37  ;;  %v2775_v53 = vld [vmem:[#allocation18_spill] sm:$0xff]  ;;  %v2779_v51 = vld [vmem:[#allocation21_spill] sm:$0xff]  ;;  %v2782_v45 = vld [vmem:[#allocation23_spill] sm:$0xff] }
  0xc8   :  { %v248_v42 = vsel %vm245_vm9, %v247_v47, %v243_v37  ;;  %v271_v36 = vmul.f32 %v1479_v54, %v229_v44  ;;  %v2771_v37 = vld [vmem:[#allocation15_spill] sm:$0xff]  ;;  %v2778_v54 = vld [vmem:[#allocation20_spill] sm:$0xff]  ;;  %v2780_v50 = vld [vmem:[#allocation22_spill] sm:$0xff] }
  0xc9   :  { %v258_v34 = vmul.f32 %v1477_v38, %v257_v59  ;;  %v270_v52 = vmul.f32 0.0, %v248_v42  ;;  %v2781_v47 = vld [vmem:[#allocation37_spill] sm:$0xff]  ;;  %v2783_v59 = vld [vmem:[#allocation24_spill] sm:$0xff]  ;;  %v2785_v42 = vld [vmem:[#allocation38_spill] sm:$0xff] }
  0xca   :  { %v2784_v44 = vld [vmem:[#allocation25_spill] sm:$0xff]  ;;  %v2788_v40 = vld [vmem:[#allocation30_spill] sm:$0xff] }
  0xcb   :  { %v2101_v46 = vadd.f32 %v271_v36, %v270_v52  ;;  %v259_v61 = vadd.f32 %v1477_v38, %v258_v34  ;;  %v2769_v34 = vld [vmem:[#allocation27_spill] sm:$0xff]  ;;  %v2770_v36 = vld [vmem:[#allocation14_spill] sm:$0xff]  ;;  %v2773_v52 = vld [vmem:[#allocation32_spill] sm:$0xff] }
  0xcd   :  { %1480 = vtanh.f32 %v2101_v46  ;;  %v263_v41 = vsel %vm262_vm12, %v1477_v38, %v259_v61  ;;  %v2772_v38 = vld [vmem:[#allocation16_spill] sm:$0xff]  ;;  %v2786_v61 = vld [vmem:[#allocation26_spill] sm:$0xff] }
  0xce   :  { %v268_v57 = vsel %vm265_vm13, %v267_v56, %v263_v41  ;;  %v2789_v41 = vld [vmem:[#allocation39_spill] sm:$0xff] }
  0xcf   :  { %v2790_v56 = vld [vmem:[#allocation31_spill] sm:$0xff] }
  0xd3   :  { %v1481_v58 = vpop.eup %1480 }
  0xd4   :  { %v2104_v49 = vmul.f32 %v1481_v58, %v268_v57  ;;  %v2791_v58 = vld [vmem:[#allocation33_spill] sm:$0xff]  ;;  %v2792_v57 = vld [vmem:[#allocation34_spill] sm:$0xff] }
  0xd6   :  { %304 = vmatmul.f32.vlgmr.msrb.gmra.mxu0 %v2104_v49  ;;  %324 = vmatmul.f32.vlgmr.msrb.gmra.mxu1 %v2104_v49 }
  0xd7   :  { %344 = vmatmul.f32.vlgmr.msrb.gmra.mxu2 %v2104_v49  ;;  %364 = vmatmul.f32.vlgmr.msrb.gmra.mxu3 %v2104_v49 }
  0xd8   :  { %610 = vmatpush.msrb.mxu0 %v1769_v0  ;;  %630 = vmatpush.msrb.mxu1 %v1771_v1 }
  0xd9   :  { %650 = vmatpush.msrb.mxu2 %v1815_v17  ;;  %670 = vmatpush.msrb.mxu3 %v1773_v2 }
  0xda   :  { %611 = vmatpush.msrb.mxu0 %v1777_v3  ;;  %631 = vmatpush.msrb.mxu1 %v1779_v4 }
  0xdb   :  { %651 = vmatpush.msrb.mxu2 %v1821_v19  ;;  %671 = vmatpush.msrb.mxu3 %v1781_v5 }
  0xdc   :  { %612 = vmatpush.msrb.mxu0 %v1784_v6  ;;  %632 = vmatpush.msrb.mxu1 %v1786_v7 }
  0xdd   :  { %652 = vmatpush.msrb.mxu2 %v1833_v23  ;;  %672 = vmatpush.msrb.mxu3 %v1790_v8 }
  0xde   :  { %613 = vmatpush.msrb.mxu0 %v1793_v9  ;;  %633 = vmatpush.msrb.mxu1 %v1795_v10 }
  0xdf   :  { %653 = vmatpush.msrb.mxu2 %v1845_v27  ;;  %673 = vmatpush.msrb.mxu3 %v1799_v11 }
  0xe0   :  { %614 = vmatpush.msrb.mxu0 %v1802_v12  ;;  %634 = vmatpush.msrb.mxu1 %v1804_v13 }
  0xe1   :  { %654 = vmatpush.msrb.mxu2 %v1857_v31  ;;  %674 = vmatpush.msrb.mxu3 %v1808_v14 }
  0xe2   :  { %615 = vmatpush.msrb.mxu0 %v1811_v15  ;;  %635 = vmatpush.msrb.mxu1 %v1813_v16 }
  0xe3   :  { %655 = vmatpush.msrb.mxu2 %v1869_v35  ;;  %675 = vmatpush.msrb.mxu3 %v1819_v18 }
  0xe4   :  { %616 = vmatpush.msrb.mxu0 %v1824_v20  ;;  %636 = vmatpush.msrb.mxu1 %v1826_v21 }
  0xe5   :  { %656 = vmatpush.msrb.mxu2 %v1881_v39  ;;  %676 = vmatpush.msrb.mxu3 %v1831_v22 }
  0xe6   :  { %617 = vmatpush.msrb.mxu0 %v1836_v24  ;;  %637 = vmatpush.msrb.mxu1 %v1838_v25 }
  0xe7   :  { %657 = vmatpush.msrb.mxu2 %v1893_v43  ;;  %677 = vmatpush.msrb.mxu3 %v1843_v26 }
  0xe8   :  { %618 = vmatpush.msrb.mxu0 %v1848_v28  ;;  %638 = vmatpush.msrb.mxu1 %v1850_v29 }
  0xe9   :  { %658 = vmatpush.msrb.mxu2 %v1908_v48  ;;  %678 = vmatpush.msrb.mxu3 %v1855_v30 }
  0xea   :  { %619 = vmatpush.msrb.mxu0 %v1860_v32  ;;  %639 = vmatpush.msrb.mxu1 %v1862_v33 }
  0xeb   :  { %659 = vmatpush.msrb.mxu2 %v2769_v34  ;;  %679 = vmatpush.msrb.mxu3 %v2770_v36 }
  0xec   :  { %620 = vmatpush.msrb.mxu0 %v2771_v37  ;;  %640 = vmatpush.msrb.mxu1 %v2772_v38 }
  0xed   :  { %660 = vmatpush.msrb.mxu2 %v2773_v52  ;;  %680 = vmatpush.msrb.mxu3 %v2774_v55 }
  0xee   :  { %621 = vmatpush.msrb.mxu0 %v2775_v53  ;;  %641 = vmatpush.msrb.mxu1 %v2776_v62  ;;  %v286_v53 = vld [vmem:[#allocation4 + $0x30] sm:$0xff] }
  0xef   :  { %661 = vmatpush.msrb.mxu2 %v2777_v63  ;;  %681 = vmatpush.msrb.mxu3 %v2778_v54 }
  0xf0   :  { %622 = vmatpush.msrb.mxu0 %v2779_v51  ;;  %642 = vmatpush.msrb.mxu1 %v2780_v50 }
  0xf1   :  { %662 = vmatpush.msrb.mxu2 %v2781_v47  ;;  %682 = vmatpush.msrb.mxu3 %v2782_v45  ;;  %v2793_v45 = vld [vmem:[#allocation40_spill] sm:$0xff] }
  0xf2   :  { %623 = vmatpush.msrb.mxu0 %v2783_v59  ;;  %643 = vmatpush.msrb.mxu1 %v2784_v44  ;;  %v2794_v59 = vld [vmem:[#allocation35_spill] sm:$0xff]  ;;  %v284_v44 = vld [vmem:[#allocation4 + $0x20] sm:$0xff] }
  0xf3   :  { %663 = vmatpush.msrb.mxu2 %v2785_v42  ;;  %683 = vmatpush.msrb.mxu3 %v2786_v61  ;;  %v285_v42 = vld [vmem:[#allocation4 + $0x28] sm:$0xff] }
  0xf4   :  { %624 = vmatpush.msrb.mxu0 %v2787_v60  ;;  %644 = vmatpush.msrb.mxu1 %v2788_v40 }
  0xf5   :  { %664 = vmatpush.msrb.mxu2 %v2789_v41  ;;  %684 = vmatpush.msrb.mxu3 %v2790_v56  ;;  %v287_v41 = vld [vmem:[#allocation4 + $0x38] sm:$0xff] }
  0xf6   :  { %625 = vmatpush.msrb.mxu0 %v2791_v58  ;;  %645 = vmatpush.msrb.mxu1 %v2792_v57 }
  0xf7   :  { %665 = vmatpush.msrb.mxu2 %v2793_v45  ;;  %685 = vmatpush.msrb.mxu3 %v2794_v59  ;;  %v2795_v59 = vld [vmem:[#allocation28_spill] sm:$0xff] }
  0xf8   :  { %vm598_vm14 = vcmp.eq.s32.totalorder %v2795_v59, 2 }
 0x153   :  { %v305_v47 = vpop.f32.mrf.mxu0  ;;  %v325_v61 = vpop.f32.mrf.mxu1 }
 0x154   :  { %v368_v50 = vadd.f32 %v305_v47, %v284_v44  ;;  %v369_v60 = vadd.f32 %v325_v61, %v285_v42  ;;  %v2796_v44 = vmov 0  }
 0x156   :  { %v1435_v51 = vmul.f32 -1.442695, %v368_v50  ;;  %v1436_v40 = vmul.f32 -1.442695, %v369_v60  ;;  %v599_v50 = vsel %vm598_vm14, 1, %v2796_v44 }
 0x157   :  { %601 = vperm.xlu1 %1464, %v599_v50  }
 0x158   :  { %1482 = vpow2.f32 %v1435_v51 }
 0x159   :  { %1484 = vpow2.f32 %v1436_v40 }
 0x15a   :  { %v365_v56 = vpop.f32.mrf.mxu3  ;;  %v345_v47 = vpop.f32.mrf.mxu2 }
 0x15b   :  { %v371_v54 = vadd.f32 %v365_v56, %v287_v41  ;;  %v370_v60 = vadd.f32 %v345_v47, %v286_v53 }
 0x15d   :  { %v1437_v58 = vmul.f32 -1.442695, %v371_v54 }
 0x15e   :  { %v1483_v63 = vpop.eup %1482 }
 0x15f   :  { %v1485_v57 = vpop.eup %1484  ;;  %v375_v62 = vadd.f32 1.0, %v1483_v63  ;;  %1486 = vpow2.f32 %v1437_v58 }
 0x160   :  { %v394_v45 = vadd.f32 1.0, %v1485_v57 }
 0x161   :  { %1488 = vrcp.f32 %v375_v62  ;;  %v387_v58 = vand.u32 2147483648, %v375_v62  ;;  %v385_v59 = vand.u32 2147483647, %v375_v62  ;;  %vm381_vm1 = vweird.f32 %v375_v62 }
 0x162   :  { %1490 = vrcp.f32 %v394_v45  ;;  %v406_v57 = vand.u32 2147483648, %v394_v45  ;;  %v404_v44 = vand.u32 2147483647, %v394_v45  ;;  %vm400_vm2 = vweird.f32 %v394_v45 }
 0x163   :  { %v388_v53 = vor.u32 1.1754944e-38, %v387_v58  ;;  %vm386_vm5 = vcmp.eq.f32.partialorder %v385_v59, 8.507059e+37 }
 0x164   :  { %vm405_vm6 = vcmp.eq.f32.partialorder %v404_v44, 8.507059e+37 }
 0x165   :  { %v1487_v42 = vpop.eup %1486 }
 0x166   :  { %v414_v51 = vadd.f32 1.0, %v1487_v42 }
 0x167   :  { %v1489_v61 = vpop.eup %1488 }
 0x168   :  { %v1491_v40 = vpop.eup %1490  ;;  %v377_v54 = vmul.f32 %v1489_v61, %v375_v62  ;;  %1492 = vrcp.f32 %v414_v51  ;;  %vm382_vm15 = vweird.f32 %v1489_v61  ;;  %vm420_vm8 = vweird.f32 %v414_v51 }
 0x169   :  { %v396_v41 = vmul.f32 %v1491_v40, %v394_v45  ;;  %1494 = vtanh.f32 %v370_v60  ;;  %vm401_vm0 = vweird.f32 %v1491_v40  ;;  %vm383_vm3 = vmor %vm381_vm1, %vm382_vm15  ;;  %v424_v59 = vand.u32 2147483647, %v414_v51 }
 0x16a   :  { %v378_v63 = vsub.f32 1.0, %v377_v54  ;;  %vm402_vm4 = vmor %vm400_vm2, %vm401_vm0  ;;  %v407_v54 = vor.u32 1.1754944e-38, %v406_v57 }
 0x16b   :  { %v397_v56 = vsub.f32 1.0, %v396_v41  ;;  %vm425_vm11 = vcmp.eq.f32.partialorder %v424_v59, 8.507059e+37 }
 0x16c   :  { %v379_v55 = vmul.f32 %v1489_v61, %v378_v63 }
 0x16d   :  { %v398_v52 = vmul.f32 %v1491_v40, %v397_v56  ;;  %v280_v56 = vpop.permute.xlu0 %279 }
 0x16e   :  { %v1493_v38 = vpop.eup %1492  ;;  %v380_v50 = vadd.f32 %v1489_v61, %v379_v55  ;;  %vm281_vm10 = vcmp.eq.s32.totalorder %v280_v56, 1 }
 0x16f   :  { %v399_v47 = vadd.f32 %v1491_v40, %v398_v52  ;;  %v416_v42 = vmul.f32 %v1493_v38, %v414_v51  ;;  %v1495_v60 = vpop.eup %1494  ;;  %vm421_vm7 = vweird.f32 %v1493_v38  ;;  %v426_v52 = vand.u32 2147483648, %v414_v51 }
 0x170   :  { %v384_v41 = vsel %vm383_vm3, %v1489_v61, %v380_v50  ;;  %vm422_vm9 = vmor %vm420_vm8, %vm421_vm7 }
 0x171   :  { %v389_v37 = vsel %vm386_vm5, %v388_v53, %v384_v41  ;;  %v403_v63 = vsel %vm402_vm4, %v1491_v40, %v399_v47  ;;  %v417_v36 = vsub.f32 1.0, %v416_v42  ;;  %v427_v44 = vor.u32 1.1754944e-38, %v426_v52  ;;  %v2824_v47 = vld [vmem:[#allocation28_spill] sm:$0xff]  ;;  %v447_v42 = vld [vmem:[#allocation4 + $0x50] sm:$0xff] }
 0x172   :  { %v408_v34 = vsel %vm405_vm6, %v407_v54, %v403_v63  ;;  %v431_v33 = vmul.f32 %v1495_v60, %v389_v37  ;;  %vm759_vm13 = vcmp.eq.s32.totalorder %v2824_v47, 3  ;;  %v2825_v41 = vmov 0  }
 0x173   :  { %v430_v55 = vmul.f32 %v408_v34, %v2101_v46  ;;  %v418_v62 = vmul.f32 %v1493_v38, %v417_v36  ;;  %v760_v60 = vsel %vm759_vm13, 1, %v2825_v41 }
 0x174   :  { %762 = vperm.xlu1 %1464, %v760_v60   ;;  %v2316_v60 = vld [vmem:[#allocation7 + $0x140] sm:$0xff] }
 0x175   :  { %v2177_v45 = vadd.f32 %v431_v33, %v430_v55  ;;  %v419_v58 = vadd.f32 %v1493_v38, %v418_v62  ;;  %v441_v61 = vpop.permute.xlu0 %440  ;;  %v282_v33 = vsel %vm281_vm10, %v2104_v49, 0.0 }
 0x176   :  { %vm442_vm12 = vcmp.eq.s32.totalorder %v441_v61, 1 }
 0x177   :  { %1496 = vtanh.f32 %v2177_v45  ;;  %v423_v40 = vsel %vm422_vm9, %v1493_v38, %v419_v58 }
 0x178   :  { %v428_v37 = vsel %vm425_vm11, %v427_v44, %v423_v40  ;;  %vm920_vm11 = vcmp.eq.s32.totalorder %v2824_v47, 4 }
 0x17d   :  { %v1497_v57 = vpop.eup %1496 }
 0x17e   :  { %v434_v46 = vmul.f32 %v1497_v57, %v428_v37 }
 0x180   :  { %v2181_v34 = vsel %vm442_vm12, %v434_v46, %v282_v33  ;;  %465 = vmatmul.f32.vlgmr.msra.gmra.mxu0 %v434_v46  ;;  %485 = vmatmul.f32.vlgmr.msra.gmra.mxu1 %v434_v46 }
 0x181   :  { %505 = vmatmul.f32.vlgmr.msra.gmra.mxu2 %v434_v46  ;;  %525 = vmatmul.f32.vlgmr.msra.gmra.mxu3 %v434_v46 }
 0x182   :  { %771 = vmatpush.msra.mxu0 %v1769_v0  ;;  %791 = vmatpush.msra.mxu1 %v1771_v1  ;;  %v2797_v0 = vld [vmem:[#allocation13_spill] sm:$0xff]  ;;  %v2798_v1 = vld [vmem:[#allocation27_spill] sm:$0xff] }
 0x183   :  { %811 = vmatpush.msra.mxu2 %v1815_v17  ;;  %831 = vmatpush.msra.mxu3 %v1773_v2  ;;  %v2799_v2 = vld [vmem:[#allocation14_spill] sm:$0xff] }
 0x184   :  { %772 = vmatpush.msra.mxu0 %v1777_v3  ;;  %792 = vmatpush.msra.mxu1 %v1779_v4  ;;  %v2800_v3 = vld [vmem:[#allocation15_spill] sm:$0xff]  ;;  %v2801_v4 = vld [vmem:[#allocation16_spill] sm:$0xff]  ;;  %v2814_v17 = vld [vmem:[#allocation38_spill] sm:$0xff] }
 0x185   :  { %812 = vmatpush.msra.mxu2 %v1821_v19  ;;  %832 = vmatpush.msra.mxu3 %v1781_v5  ;;  %v2802_v5 = vld [vmem:[#allocation32_spill] sm:$0xff]  ;;  %v2816_v19 = vld [vmem:[#allocation29_spill] sm:$0xff] }
 0x186   :  { %773 = vmatpush.msra.mxu0 %v1784_v6  ;;  %793 = vmatpush.msra.mxu1 %v1786_v7  ;;  %v2803_v6 = vld [vmem:[#allocation17_spill] sm:$0xff]  ;;  %v2804_v7 = vld [vmem:[#allocation18_spill] sm:$0xff] }
 0x187   :  { %813 = vmatpush.msra.mxu2 %v1833_v23  ;;  %833 = vmatpush.msra.mxu3 %v1790_v8  ;;  %v2805_v8 = vld [vmem:[#allocation19_spill] sm:$0xff]  ;;  %v2820_v23 = vld [vmem:[#allocation33_spill] sm:$0xff] }
 0x188   :  { %774 = vmatpush.msra.mxu0 %v1793_v9  ;;  %794 = vmatpush.msra.mxu1 %v1795_v10  ;;  %v2806_v9 = vld [vmem:[#allocation36_spill] sm:$0xff] }
 0x189   :  { %814 = vmatpush.msra.mxu2 %v1845_v27  ;;  %834 = vmatpush.msra.mxu3 %v1799_v11  ;;  %v2807_v10 = vld [vmem:[#allocation20_spill] sm:$0xff]  ;;  %v2808_v11 = vld [vmem:[#allocation21_spill] sm:$0xff] }
 0x18a   :  { %775 = vmatpush.msra.mxu0 %v1802_v12  ;;  %795 = vmatpush.msra.mxu1 %v1804_v13  ;;  %v2809_v12 = vld [vmem:[#allocation22_spill] sm:$0xff]  ;;  %v2810_v13 = vld [vmem:[#allocation37_spill] sm:$0xff]  ;;  %v445_v27 = vld [vmem:[#allocation4 + $0x40] sm:$0xff] }
 0x18b   :  { %815 = vmatpush.msra.mxu2 %v1857_v31  ;;  %835 = vmatpush.msra.mxu3 %v1808_v14  ;;  %v2811_v14 = vld [vmem:[#allocation23_spill] sm:$0xff] }
 0x18c   :  { %776 = vmatpush.msra.mxu0 %v1811_v15  ;;  %796 = vmatpush.msra.mxu1 %v1813_v16  ;;  %v2812_v15 = vld [vmem:[#allocation24_spill] sm:$0xff]  ;;  %v2813_v16 = vld [vmem:[#allocation25_spill] sm:$0xff] }
 0x18d   :  { %816 = vmatpush.msra.mxu2 %v1869_v35  ;;  %836 = vmatpush.msra.mxu3 %v1819_v18  ;;  %v2815_v18 = vld [vmem:[#allocation26_spill] sm:$0xff] }
 0x18e   :  { %777 = vmatpush.msra.mxu0 %v1824_v20  ;;  %797 = vmatpush.msra.mxu1 %v1826_v21  ;;  %v2817_v20 = vld [vmem:[#allocation30_spill] sm:$0xff]  ;;  %v2818_v21 = vld [vmem:[#allocation39_spill] sm:$0xff] }
 0x18f   :  { %817 = vmatpush.msra.mxu2 %v1881_v39  ;;  %837 = vmatpush.msra.mxu3 %v1831_v22  ;;  %v2819_v22 = vld [vmem:[#allocation31_spill] sm:$0xff] }
 0x190   :  { %778 = vmatpush.msra.mxu0 %v1836_v24  ;;  %798 = vmatpush.msra.mxu1 %v1838_v25  ;;  %v2821_v24 = vld [vmem:[#allocation34_spill] sm:$0xff]  ;;  %v2822_v25 = vld [vmem:[#allocation40_spill] sm:$0xff] }
 0x191   :  { %818 = vmatpush.msra.mxu2 %v1893_v43  ;;  %838 = vmatpush.msra.mxu3 %v1843_v26  ;;  %v2823_v26 = vld [vmem:[#allocation35_spill] sm:$0xff] }
 0x192   :  { %779 = vmatpush.msra.mxu0 %v1848_v28  ;;  %799 = vmatpush.msra.mxu1 %v1850_v29  ;;  %v446_v28 = vld [vmem:[#allocation4 + $0x48] sm:$0xff]  ;;  %v448_v43 = vld [vmem:[#allocation4 + $0x58] sm:$0xff] }
 0x193   :  { %819 = vmatpush.msra.mxu2 %v1908_v48  ;;  %839 = vmatpush.msra.mxu3 %v1855_v30 }
 0x194   :  { %780 = vmatpush.msra.mxu0 %v1860_v32  ;;  %800 = vmatpush.msra.mxu1 %v2797_v0 }
 0x195   :  { %820 = vmatpush.msra.mxu2 %v2798_v1  ;;  %840 = vmatpush.msra.mxu3 %v2799_v2 }
 0x196   :  { %781 = vmatpush.msra.mxu0 %v2800_v3  ;;  %801 = vmatpush.msra.mxu1 %v2801_v4 }
 0x197   :  { %821 = vmatpush.msra.mxu2 %v2802_v5  ;;  %841 = vmatpush.msra.mxu3 %v2803_v6 }
 0x198   :  { %782 = vmatpush.msra.mxu0 %v2804_v7  ;;  %802 = vmatpush.msra.mxu1 %v2805_v8 }
 0x199   :  { %822 = vmatpush.msra.mxu2 %v2806_v9  ;;  %842 = vmatpush.msra.mxu3 %v2807_v10 }
 0x19a   :  { %783 = vmatpush.msra.mxu0 %v2808_v11  ;;  %803 = vmatpush.msra.mxu1 %v2809_v12 }
 0x19b   :  { %823 = vmatpush.msra.mxu2 %v2810_v13  ;;  %843 = vmatpush.msra.mxu3 %v2811_v14 }
 0x19c   :  { %784 = vmatpush.msra.mxu0 %v2812_v15  ;;  %804 = vmatpush.msra.mxu1 %v2813_v16 }
 0x19d   :  { %824 = vmatpush.msra.mxu2 %v2814_v17  ;;  %844 = vmatpush.msra.mxu3 %v2815_v18 }
 0x19e   :  { %785 = vmatpush.msra.mxu0 %v2816_v19  ;;  %805 = vmatpush.msra.mxu1 %v2817_v20 }
 0x19f   :  { %825 = vmatpush.msra.mxu2 %v2818_v21  ;;  %845 = vmatpush.msra.mxu3 %v2819_v22 }
 0x1a0   :  { %786 = vmatpush.msra.mxu0 %v2820_v23  ;;  %806 = vmatpush.msra.mxu1 %v2821_v24 }
 0x1a1   :  { %826 = vmatpush.msra.mxu2 %v2822_v25  ;;  %846 = vmatpush.msra.mxu3 %v2823_v26  ;;  %v2256_v26 = vld [vmem:[#allocation7 + $0x1e0] sm:$0xff] }
 0x1c9   :  { %v602_v20 = vpop.permute.xlu1 %601 }
 0x1ca   :  { %vm603_vm10 = vcmp.eq.s32.totalorder %v602_v20, 1  ;;  %v2418_v20 = vld [vmem:[#allocation7 + $0x50] sm:$0xff] }
 0x1cb   :  { %2843 = vst [vmem:[#allocation38_spill] sm:$0xff] %v2418_v20 }
 0x1fd   :  { %v466_v29 = vpop.f32.mrf.mxu0  ;;  %v486_v30 = vpop.f32.mrf.mxu1 }
 0x1fe   :  { %v529_v31 = vadd.f32 %v466_v29, %v445_v27  ;;  %v530_v32 = vadd.f32 %v486_v30, %v446_v28  ;;  %v2259_v27 = vld [vmem:[#allocation7 + $0x1e8] sm:$0xff]  ;;  %v2262_v28 = vld [vmem:[#allocation7 + $0x1f0] sm:$0xff]  ;;  %v2265_v29 = vld [vmem:[#allocation7 + $0x1f8] sm:$0xff] }
 0x1ff   :  { %v2271_v30 = vld [vmem:[#allocation7 + $0x1c8] sm:$0xff] }
 0x200   :  { %v1438_v35 = vmul.f32 -1.442695, %v529_v31  ;;  %v1439_v39 = vmul.f32 -1.442695, %v530_v32  ;;  %v2274_v31 = vld [vmem:[#allocation7 + $0x1d0] sm:$0xff]  ;;  %v2277_v32 = vld [vmem:[#allocation7 + $0x1d8] sm:$0xff] }
 0x202   :  { %1498 = vpow2.f32 %v1438_v35  ;;  %v2280_v35 = vld [vmem:[#allocation7 + $0x1a0] sm:$0xff] }
 0x203   :  { %1500 = vpow2.f32 %v1439_v39  ;;  %v2283_v39 = vld [vmem:[#allocation7 + $0x1a8] sm:$0xff] }
 0x204   :  { %v526_v48 = vpop.f32.mrf.mxu3  ;;  %v506_v54 = vpop.f32.mrf.mxu2 }
 0x205   :  { %v532_v49 = vadd.f32 %v526_v48, %v448_v43  ;;  %v531_v62 = vadd.f32 %v506_v54, %v447_v42  ;;  %v2286_v43 = vld [vmem:[#allocation7 + $0x1b0] sm:$0xff]  ;;  %v2289_v48 = vld [vmem:[#allocation7 + $0x1b8] sm:$0xff] }
 0x206   :  { %v2310_v42 = vld [vmem:[#allocation7 + $0x170] sm:$0xff]  ;;  %v2313_v54 = vld [vmem:[#allocation7 + $0x178] sm:$0xff] }
 0x207   :  { %v1440_v36 = vmul.f32 -1.442695, %v532_v49  ;;  %v2292_v49 = vld [vmem:[#allocation7 + $0x180] sm:$0xff] }
 0x208   :  { %v1499_v38 = vpop.eup %1498 }
 0x209   :  { %v1501_v51 = vpop.eup %1500  ;;  %v536_v50 = vadd.f32 1.0, %v1499_v38  ;;  %1502 = vpow2.f32 %v1440_v36  ;;  %v2295_v36 = vld [vmem:[#allocation7 + $0x188] sm:$0xff]  ;;  %v2298_v38 = vld [vmem:[#allocation7 + $0x190] sm:$0xff] }
 0x20a   :  { %v555_v53 = vadd.f32 1.0, %v1501_v51  ;;  %v2301_v51 = vld [vmem:[#allocation7 + $0x198] sm:$0xff] }
 0x20b   :  { %1504 = vrcp.f32 %v536_v50  ;;  %v548_v44 = vand.u32 2147483648, %v536_v50  ;;  %v546_v46 = vand.u32 2147483647, %v536_v50  ;;  %vm542_vm0 = vweird.f32 %v536_v50 }
 0x20c   :  { %1506 = vrcp.f32 %v555_v53  ;;  %v567_v57 = vand.u32 2147483648, %v555_v53  ;;  %v565_v0 = vand.u32 2147483647, %v555_v53  ;;  %vm561_vm1 = vweird.f32 %v555_v53 }
 0x20d   :  { %v549_v3 = vor.u32 1.1754944e-38, %v548_v44  ;;  %vm547_vm4 = vcmp.eq.f32.partialorder %v546_v46, 8.507059e+37  ;;  %v2346_v44 = vld [vmem:[#allocation7 + $0x110] sm:$0xff]  ;;  %v2355_v46 = vld [vmem:[#allocation7 + $0xe8] sm:$0xff] }
 0x20e   :  { %v568_v6 = vor.u32 1.1754944e-38, %v567_v57  ;;  %vm566_vm5 = vcmp.eq.f32.partialorder %v565_v0, 8.507059e+37  ;;  %v2349_v57 = vld [vmem:[#allocation7 + $0x118] sm:$0xff] }
 0x20f   :  { %v1503_v63 = vpop.eup %1502  ;;  %v2361_v0 = vld [vmem:[#allocation7 + $0xf8] sm:$0xff] }
 0x210   :  { %v575_v56 = vadd.f32 1.0, %v1503_v63  ;;  %v2319_v63 = vld [vmem:[#allocation7 + $0x148] sm:$0xff] }
 0x211   :  { %v1505_v55 = vpop.eup %1504 }
 0x212   :  { %v1507_v58 = vpop.eup %1506  ;;  %v538_v52 = vmul.f32 %v1505_v55, %v536_v50  ;;  %1508 = vrcp.f32 %v575_v56  ;;  %vm543_vm14 = vweird.f32 %v1505_v55  ;;  %v587_v18 = vand.u32 2147483648, %v575_v56  ;;  %v2304_v50 = vld [vmem:[#allocation7 + $0x160] sm:$0xff] }
 0x213   :  { %v557_v59 = vmul.f32 %v1507_v58, %v555_v53  ;;  %1510 = vtanh.f32 %v531_v62  ;;  %vm562_vm15 = vweird.f32 %v1507_v58  ;;  %vm544_vm2 = vmor %vm542_vm0, %vm543_vm14  ;;  %vm581_vm7 = vweird.f32 %v575_v56  ;;  %v2307_v53 = vld [vmem:[#allocation7 + $0x168] sm:$0xff]  ;;  %v2328_v62 = vld [vmem:[#allocation7 + $0x120] sm:$0xff] }
 0x214   :  { %v539_v61 = vsub.f32 1.0, %v538_v52  ;;  %vm563_vm3 = vmor %vm561_vm1, %vm562_vm15  ;;  %v585_v19 = vand.u32 2147483647, %v575_v56  ;;  %v588_v22 = vor.u32 1.1754944e-38, %v587_v18  ;;  %v2334_v52 = vld [vmem:[#allocation7 + $0x130] sm:$0xff]  ;;  %v2412_v18 = vld [vmem:[#allocation7 + $0x40] sm:$0xff] }
 0x215   :  { %v558_v40 = vsub.f32 1.0, %v557_v59  ;;  %v2337_v59 = vld [vmem:[#allocation7 + $0x138] sm:$0xff]  ;;  %2841 = vst [vmem:[#allocation24_spill] sm:$0xff] %v2412_v18 }
 0x216   :  { %v540_v37 = vmul.f32 %v1505_v55, %v539_v61  ;;  %vm586_vm9 = vcmp.eq.f32.partialorder %v585_v19, 8.507059e+37  ;;  %v2340_v61 = vld [vmem:[#allocation7 + $0x100] sm:$0xff]  ;;  %v2415_v19 = vld [vmem:[#allocation7 + $0x48] sm:$0xff] }
 0x217   :  { %v559_v33 = vmul.f32 %v1507_v58, %v558_v40  ;;  %v2343_v40 = vld [vmem:[#allocation7 + $0x108] sm:$0xff]  ;;  %2842 = vst [vmem:[#allocation25_spill] sm:$0xff] %v2415_v19 }
 0x218   :  { %v1509_v1 = vpop.eup %1508  ;;  %v541_v2 = vadd.f32 %v1505_v55, %v540_v37  ;;  %v2352_v37 = vld [vmem:[#allocation7 + $0xe0] sm:$0xff] }
 0x219   :  { %v560_v4 = vadd.f32 %v1507_v58, %v559_v33  ;;  %v577_v5 = vmul.f32 %v1509_v1, %v575_v56  ;;  %v1511_v8 = vpop.eup %1510  ;;  %vm582_vm6 = vweird.f32 %v1509_v1  ;;  %v2322_v56 = vld [vmem:[#allocation7 + $0x150] sm:$0xff] }
 0x21a   :  { %v545_v7 = vsel %vm544_vm2, %v1505_v55, %v541_v2  ;;  %vm583_vm8 = vmor %vm581_vm7, %vm582_vm6  ;;  %v2325_v55 = vld [vmem:[#allocation7 + $0x158] sm:$0xff]  ;;  %v2358_v33 = vld [vmem:[#allocation7 + $0xf0] sm:$0xff] }
 0x21b   :  { %v550_v9 = vsel %vm547_vm4, %v549_v3, %v545_v7  ;;  %v564_v10 = vsel %vm563_vm3, %v1507_v58, %v560_v4  ;;  %v578_v11 = vsub.f32 1.0, %v577_v5  ;;  %v2331_v58 = vld [vmem:[#allocation7 + $0x128] sm:$0xff]  ;;  %v2370_v3 = vld [vmem:[#allocation7 + $0xd0] sm:$0xff]  ;;  %v2373_v4 = vld [vmem:[#allocation7 + $0xd8] sm:$0xff] }
 0x21c   :  { %v569_v12 = vsel %vm566_vm5, %v568_v6, %v564_v10  ;;  %v592_v13 = vmul.f32 %v1511_v8, %v550_v9  ;;  %v2367_v2 = vld [vmem:[#allocation7 + $0xc8] sm:$0xff]  ;;  %2827 = vst [vmem:[#allocation27_spill] sm:$0xff] %v2370_v3  ;;  %v2376_v5 = vld [vmem:[#allocation7 + $0xa0] sm:$0xff]  ;;  %v2382_v7 = vld [vmem:[#allocation7 + $0xb0] sm:$0xff] }
 0x21d   :  { %v591_v14 = vmul.f32 %v569_v12, %v2177_v45  ;;  %v579_v15 = vmul.f32 %v1509_v1, %v578_v11  ;;  %2826 = vst [vmem:[#allocation13_spill] sm:$0xff] %v2367_v2  ;;  %v2379_v6 = vld [vmem:[#allocation7 + $0xa8] sm:$0xff]  ;;  %v2385_v8 = vld [vmem:[#allocation7 + $0xb8] sm:$0xff]  ;;  %v2388_v9 = vld [vmem:[#allocation7 + $0x80] sm:$0xff] }
 0x21e   :  { %2828 = vst [vmem:[#allocation14_spill] sm:$0xff] %v2373_v4  ;;  %v2391_v10 = vld [vmem:[#allocation7 + $0x88] sm:$0xff]  ;;  %v2394_v11 = vld [vmem:[#allocation7 + $0x90] sm:$0xff]  ;;  %v2397_v12 = vld [vmem:[#allocation7 + $0x98] sm:$0xff] }
 0x21f   :  { %v2250_v16 = vadd.f32 %v592_v13, %v591_v14  ;;  %v580_v17 = vadd.f32 %v1509_v1, %v579_v15  ;;  %2829 = vst [vmem:[#allocation15_spill] sm:$0xff] %v2376_v5  ;;  %v2400_v13 = vld [vmem:[#allocation7 + $0x60] sm:$0xff]  ;;  %v2403_v14 = vld [vmem:[#allocation7 + $0x68] sm:$0xff]  ;;  %v2406_v15 = vld [vmem:[#allocation7 + $0x70] sm:$0xff] }
 0x220   :  { %2830 = vst [vmem:[#allocation16_spill] sm:$0xff] %v2379_v6 }
 0x221   :  { %1512 = vtanh.f32 %v2250_v16  ;;  %v584_v21 = vsel %vm583_vm8, %v1509_v1, %v580_v17  ;;  %v2364_v1 = vld [vmem:[#allocation7 + $0xc0] sm:$0xff]  ;;  %2831 = vst [vmem:[#allocation32_spill] sm:$0xff] %v2382_v7  ;;  %v2409_v17 = vld [vmem:[#allocation7 + $0x78] sm:$0xff] }
 0x222   :  { %v589_v24 = vsel %vm586_vm9, %v588_v22, %v584_v21  ;;  %2832 = vst [vmem:[#allocation17_spill] sm:$0xff] %v2385_v8  ;;  %v2421_v21 = vld [vmem:[#allocation7 + $0x58] sm:$0xff]  ;;  %v2424_v22 = vld [vmem:[#allocation7 + $0x20] sm:$0xff] }
 0x223   :  { %2833 = vst [vmem:[#allocation18_spill] sm:$0xff] %v2388_v9 }
 0x224   :  { %2834 = vst [vmem:[#allocation19_spill] sm:$0xff] %v2391_v10 }
 0x225   :  { %2835 = vst [vmem:[#allocation36_spill] sm:$0xff] %v2394_v11 }
 0x226   :  { %2836 = vst [vmem:[#allocation20_spill] sm:$0xff] %v2397_v12 }
 0x227   :  { %v1513_v23 = vpop.eup %1512  ;;  %2837 = vst [vmem:[#allocation21_spill] sm:$0xff] %v2400_v13 }
 0x228   :  { %v595_v25 = vmul.f32 %v1513_v23, %v589_v24  ;;  %2838 = vst [vmem:[#allocation22_spill] sm:$0xff] %v2403_v14  ;;  %v2427_v23 = vld [vmem:[#allocation7 + $0x28] sm:$0xff]  ;;  %v2430_v24 = vld [vmem:[#allocation7 + $0x30] sm:$0xff] }
 0x229   :  { %2839 = vst [vmem:[#allocation37_spill] sm:$0xff] %v2406_v15 }
 0x22a   :  { %v2254_v45 = vsel %vm603_vm10, %v595_v25, %v2181_v34  ;;  %626 = vmatmul.f32.vlgmr.msrb.gmra.mxu0 %v595_v25  ;;  %646 = vmatmul.f32.vlgmr.msrb.gmra.mxu1 %v595_v25  ;;  %v2268_v34 = vld [vmem:[#allocation7 + $0x1c0] sm:$0xff]  ;;  %2840 = vst [vmem:[#allocation23_spill] sm:$0xff] %v2409_v17 }
 0x22b   :  { %666 = vmatmul.f32.vlgmr.msrb.gmra.mxu2 %v595_v25  ;;  %686 = vmatmul.f32.vlgmr.msrb.gmra.mxu3 %v595_v25  ;;  %2844 = vst [vmem:[#allocation26_spill] sm:$0xff] %v2421_v21  ;;  %v2433_v25 = vld [vmem:[#allocation7 + $0x38] sm:$0xff] }
 0x22c   :  { %932 = vmatpush.msrb.mxu0 %v2256_v26  ;;  %952 = vmatpush.msrb.mxu1 %v2259_v27  ;;  %2845 = vst [vmem:[#allocation29_spill] sm:$0xff] %v2424_v22 }
 0x22d   :  { %972 = vmatpush.msrb.mxu2 %v2262_v28  ;;  %992 = vmatpush.msrb.mxu3 %v2265_v29  ;;  %2846 = vst [vmem:[#allocation30_spill] sm:$0xff] %v2427_v23 }
 0x22e   :  { %933 = vmatpush.msrb.mxu0 %v2268_v34  ;;  %953 = vmatpush.msrb.mxu1 %v2271_v30  ;;  %2847 = vst [vmem:[#allocation39_spill] sm:$0xff] %v2430_v24 }
 0x22f   :  { %973 = vmatpush.msrb.mxu2 %v2274_v31  ;;  %993 = vmatpush.msrb.mxu3 %v2277_v32  ;;  %2848 = vst [vmem:[#allocation31_spill] sm:$0xff] %v2433_v25 }
 0x230   :  { %934 = vmatpush.msrb.mxu0 %v2280_v35  ;;  %954 = vmatpush.msrb.mxu1 %v2283_v39 }
 0x231   :  { %974 = vmatpush.msrb.mxu2 %v2286_v43  ;;  %994 = vmatpush.msrb.mxu3 %v2289_v48 }
 0x232   :  { %935 = vmatpush.msrb.mxu0 %v2292_v49  ;;  %955 = vmatpush.msrb.mxu1 %v2295_v36 }
 0x233   :  { %975 = vmatpush.msrb.mxu2 %v2298_v38  ;;  %995 = vmatpush.msrb.mxu3 %v2301_v51 }
 0x234   :  { %936 = vmatpush.msrb.mxu0 %v2304_v50  ;;  %956 = vmatpush.msrb.mxu1 %v2307_v53 }
 0x235   :  { %976 = vmatpush.msrb.mxu2 %v2310_v42  ;;  %996 = vmatpush.msrb.mxu3 %v2313_v54 }
 0x236   :  { %937 = vmatpush.msrb.mxu0 %v2316_v60  ;;  %957 = vmatpush.msrb.mxu1 %v2319_v63 }
 0x237   :  { %977 = vmatpush.msrb.mxu2 %v2322_v56  ;;  %997 = vmatpush.msrb.mxu3 %v2325_v55 }
 0x238   :  { %938 = vmatpush.msrb.mxu0 %v2328_v62  ;;  %958 = vmatpush.msrb.mxu1 %v2331_v58 }
 0x239   :  { %978 = vmatpush.msrb.mxu2 %v2334_v52  ;;  %998 = vmatpush.msrb.mxu3 %v2337_v59 }
 0x23a   :  { %939 = vmatpush.msrb.mxu0 %v2340_v61  ;;  %959 = vmatpush.msrb.mxu1 %v2343_v40 }
 0x23b   :  { %979 = vmatpush.msrb.mxu2 %v2346_v44  ;;  %999 = vmatpush.msrb.mxu3 %v2349_v57 }
 0x23c   :  { %940 = vmatpush.msrb.mxu0 %v2352_v37  ;;  %960 = vmatpush.msrb.mxu1 %v2355_v46 }
 0x23d   :  { %980 = vmatpush.msrb.mxu2 %v2358_v33  ;;  %1000 = vmatpush.msrb.mxu3 %v2361_v0 }
 0x23e   :  { %941 = vmatpush.msrb.mxu0 %v2364_v1  ;;  %961 = vmatpush.msrb.mxu1 %v2367_v2 }
 0x23f   :  { %981 = vmatpush.msrb.mxu2 %v2370_v3  ;;  %1001 = vmatpush.msrb.mxu3 %v2373_v4 }
 0x240   :  { %942 = vmatpush.msrb.mxu0 %v2376_v5  ;;  %962 = vmatpush.msrb.mxu1 %v2379_v6 }
 0x241   :  { %982 = vmatpush.msrb.mxu2 %v2382_v7  ;;  %1002 = vmatpush.msrb.mxu3 %v2385_v8 }
 0x242   :  { %943 = vmatpush.msrb.mxu0 %v2388_v9  ;;  %963 = vmatpush.msrb.mxu1 %v2391_v10 }
 0x243   :  { %983 = vmatpush.msrb.mxu2 %v2394_v11  ;;  %1003 = vmatpush.msrb.mxu3 %v2397_v12 }
 0x244   :  { %944 = vmatpush.msrb.mxu0 %v2400_v13  ;;  %964 = vmatpush.msrb.mxu1 %v2403_v14  ;;  %v609_v13 = vld [vmem:[#allocation4 + $0x78] sm:$0xff] }
 0x245   :  { %984 = vmatpush.msrb.mxu2 %v2406_v15  ;;  %1004 = vmatpush.msrb.mxu3 %v2409_v17 }
 0x246   :  { %945 = vmatpush.msrb.mxu0 %v2412_v18  ;;  %965 = vmatpush.msrb.mxu1 %v2415_v19  ;;  %v607_v19 = vld [vmem:[#allocation4 + $0x68] sm:$0xff] }
 0x247   :  { %985 = vmatpush.msrb.mxu2 %v2418_v20  ;;  %1005 = vmatpush.msrb.mxu3 %v2421_v21  ;;  %v2436_v20 = vld [vmem:[#allocation7] sm:$0xff]  ;;  %v2439_v21 = vld [vmem:[#allocation7 + $0x8] sm:$0xff] }
 0x248   :  { %946 = vmatpush.msrb.mxu0 %v2424_v22  ;;  %966 = vmatpush.msrb.mxu1 %v2427_v23  ;;  %2849 = vst [vmem:[#allocation33_spill] sm:$0xff] %v2436_v20  ;;  %v2442_v22 = vld [vmem:[#allocation7 + $0x10] sm:$0xff]  ;;  %v2445_v23 = vld [vmem:[#allocation7 + $0x18] sm:$0xff] }
 0x249   :  { %986 = vmatpush.msrb.mxu2 %v2430_v24  ;;  %1006 = vmatpush.msrb.mxu3 %v2433_v25  ;;  %2850 = vst [vmem:[#allocation34_spill] sm:$0xff] %v2439_v21  ;;  %v606_v24 = vld [vmem:[#allocation4 + $0x60] sm:$0xff] }
 0x24a   :  { %947 = vmatpush.msrb.mxu0 %v2436_v20  ;;  %967 = vmatpush.msrb.mxu1 %v2439_v21  ;;  %2851 = vst [vmem:[#allocation40_spill] sm:$0xff] %v2442_v22 }
 0x24b   :  { %987 = vmatpush.msrb.mxu2 %v2442_v22  ;;  %2852 = vst [vmem:[#allocation35_spill] sm:$0xff] %v2445_v23  ;;  %1007 = vmatpush.msrb.mxu3 %v2445_v23  ;;  %v608_v23 = vld [vmem:[#allocation4 + $0x70] sm:$0xff] }
 0x2a7   :  { %v627_v18 = vpop.f32.mrf.mxu0  ;;  %v647_v25 = vpop.f32.mrf.mxu1 }
 0x2a8   :  { %v690_v17 = vadd.f32 %v627_v18, %v606_v24  ;;  %v691_v15 = vadd.f32 %v647_v25, %v607_v19 }
 0x2aa   :  { %v1441_v14 = vmul.f32 -1.442695, %v690_v17  ;;  %v1442_v20 = vmul.f32 -1.442695, %v691_v15  ;;  %v921_v17 = vsel %vm920_vm11, 1, %v2825_v41 }
 0x2ab   :  { %923 = vperm.xlu2 %1465, %v921_v17  }
 0x2ac   :  { %1514 = vpow2.f32 %v1441_v14 }
 0x2ad   :  { %1516 = vpow2.f32 %v1442_v20 }
 0x2ae   :  { %v687_v21 = vpop.f32.mrf.mxu3  ;;  %v667_v18 = vpop.f32.mrf.mxu2 }
 0x2af   :  { %v693_v12 = vadd.f32 %v687_v21, %v609_v13  ;;  %v692_v20 = vadd.f32 %v667_v18, %v608_v23 }
 0x2b1   :  { %v1443_v11 = vmul.f32 -1.442695, %v693_v12 }
 0x2b2   :  { %v1515_v10 = vpop.eup %1514 }
 0x2b3   :  { %v1517_v22 = vpop.eup %1516  ;;  %v697_v9 = vadd.f32 1.0, %v1515_v10  ;;  %1518 = vpow2.f32 %v1443_v11 }
 0x2b4   :  { %v716_v8 = vadd.f32 1.0, %v1517_v22 }
 0x2b5   :  { %1520 = vrcp.f32 %v697_v9  ;;  %v709_v22 = vand.u32 2147483648, %v697_v9  ;;  %v707_v47 = vand.u32 2147483647, %v697_v9  ;;  %vm703_vm14 = vweird.f32 %v697_v9 }
 0x2b6   :  { %1522 = vrcp.f32 %v716_v8  ;;  %v728_v24 = vand.u32 2147483648, %v716_v8  ;;  %v726_v41 = vand.u32 2147483647, %v716_v8  ;;  %vm722_vm15 = vweird.f32 %v716_v8 }
 0x2b7   :  { %v710_v23 = vor.u32 1.1754944e-38, %v709_v22  ;;  %vm708_vm2 = vcmp.eq.f32.partialorder %v707_v47, 8.507059e+37  ;;  %v763_v47 = vpop.permute.xlu1 %762 }
 0x2b8   :  { %vm727_vm3 = vcmp.eq.f32.partialorder %v726_v41, 8.507059e+37  ;;  %vm764_vm8 = vcmp.eq.s32.totalorder %v763_v47, 1  ;;  %v2872_v47 = vld [vmem:[#allocation29_spill] sm:$0xff] }
 0x2b9   :  { %v1519_v15 = vpop.eup %1518 }
 0x2ba   :  { %v736_v14 = vadd.f32 1.0, %v1519_v15 }
 0x2bb   :  { %v1521_v19 = vpop.eup %1520 }
 0x2bc   :  { %v1523_v13 = vpop.eup %1522  ;;  %v699_v12 = vmul.f32 %v1521_v19, %v697_v9  ;;  %1524 = vrcp.f32 %v736_v14  ;;  %vm704_vm12 = vweird.f32 %v1521_v19  ;;  %vm742_vm5 = vweird.f32 %v736_v14 }
 0x2bd   :  { %v718_v21 = vmul.f32 %v1523_v13, %v716_v8  ;;  %1526 = vtanh.f32 %v692_v20  ;;  %vm723_vm13 = vweird.f32 %v1523_v13  ;;  %vm705_vm0 = vmor %vm703_vm14, %vm704_vm12 }
 0x2be   :  { %v700_v10 = vsub.f32 1.0, %v699_v12  ;;  %vm724_vm1 = vmor %vm722_vm15, %vm723_vm13  ;;  %v729_v12 = vor.u32 1.1754944e-38, %v728_v24 }
 0x2bf   :  { %v719_v11 = vsub.f32 1.0, %v718_v21 }
 0x2c0   :  { %v701_v25 = vmul.f32 %v1521_v19, %v700_v10 }
 0x2c1   :  { %v720_v7 = vmul.f32 %v1523_v13, %v719_v11 }
 0x2c2   :  { %v1525_v6 = vpop.eup %1524  ;;  %v702_v17 = vadd.f32 %v1521_v19, %v701_v25 }
 0x2c3   :  { %v721_v18 = vadd.f32 %v1523_v13, %v720_v7  ;;  %v738_v15 = vmul.f32 %v1525_v6, %v736_v14  ;;  %v1527_v20 = vpop.eup %1526  ;;  %vm743_vm4 = vweird.f32 %v1525_v6  ;;  %v748_v7 = vand.u32 2147483648, %v736_v14 }
 0x2c4   :  { %v706_v21 = vsel %vm705_vm0, %v1521_v19, %v702_v17  ;;  %v746_v19 = vand.u32 2147483647, %v736_v14  ;;  %vm744_vm6 = vmor %vm742_vm5, %vm743_vm4  ;;  %v2858_v14 = vld [vmem:[#allocation32_spill] sm:$0xff]  ;;  %v2859_v17 = vld [vmem:[#allocation17_spill] sm:$0xff] }
 0x2c5   :  { %v711_v5 = vsel %vm708_vm2, %v710_v23, %v706_v21  ;;  %v725_v10 = vsel %vm724_vm1, %v1523_v13, %v721_v18  ;;  %v739_v4 = vsub.f32 1.0, %v738_v15  ;;  %v749_v13 = vor.u32 1.1754944e-38, %v748_v7  ;;  %v2860_v23 = vld [vmem:[#allocation18_spill] sm:$0xff]  ;;  %v2861_v18 = vld [vmem:[#allocation19_spill] sm:$0xff]  ;;  %v2862_v15 = vld [vmem:[#allocation36_spill] sm:$0xff] }
 0x2c6   :  { %v730_v11 = vsel %vm727_vm3, %v729_v12, %v725_v10  ;;  %v753_v3 = vmul.f32 %v1527_v20, %v711_v5  ;;  %vm747_vm7 = vcmp.eq.f32.partialorder %v746_v19, 8.507059e+37  ;;  %v2863_v12 = vld [vmem:[#allocation20_spill] sm:$0xff]  ;;  %v2864_v21 = vld [vmem:[#allocation21_spill] sm:$0xff]  ;;  %v2865_v20 = vld [vmem:[#allocation22_spill] sm:$0xff] }
 0x2c7   :  { %v752_v2 = vmul.f32 %v730_v11, %v2250_v16  ;;  %v740_v25 = vmul.f32 %v1525_v6, %v739_v4  ;;  %v2856_v4 = vld [vmem:[#allocation15_spill] sm:$0xff]  ;;  %v2866_v10 = vld [vmem:[#allocation37_spill] sm:$0xff]  ;;  %v2870_v7 = vld [vmem:[#allocation38_spill] sm:$0xff] }
 0x2c8   :  { %v2867_v11 = vld [vmem:[#allocation23_spill] sm:$0xff]  ;;  %v2871_v19 = vld [vmem:[#allocation26_spill] sm:$0xff] }
 0x2c9   :  { %v2451_v9 = vadd.f32 %v753_v3, %v752_v2  ;;  %v741_v8 = vadd.f32 %v1525_v6, %v740_v25  ;;  %v2854_v2 = vld [vmem:[#allocation27_spill] sm:$0xff]  ;;  %v2855_v3 = vld [vmem:[#allocation14_spill] sm:$0xff]  ;;  %v2868_v25 = vld [vmem:[#allocation24_spill] sm:$0xff] }
 0x2cb   :  { %1528 = vtanh.f32 %v2451_v9  ;;  %v745_v22 = vsel %vm744_vm6, %v1525_v6, %v741_v8  ;;  %v2857_v6 = vld [vmem:[#allocation16_spill] sm:$0xff]  ;;  %v2869_v8 = vld [vmem:[#allocation25_spill] sm:$0xff] }
 0x2cc   :  { %v750_v24 = vsel %vm747_vm7, %v749_v13, %v745_v22  ;;  %v2873_v22 = vld [vmem:[#allocation30_spill] sm:$0xff]  ;;  %v2874_v13 = vld [vmem:[#allocation39_spill] sm:$0xff] }
 0x2d1   :  { %v1529_v41 = vpop.eup %1528 }
 0x2d2   :  { %v756_v5 = vmul.f32 %v1529_v41, %v750_v24  ;;  %v2875_v41 = vld [vmem:[#allocation31_spill] sm:$0xff]  ;;  %v2876_v24 = vld [vmem:[#allocation33_spill] sm:$0xff] }
 0x2d4   :  { %v2455_v16 = vsel %vm764_vm8, %v756_v5, %v2254_v45  ;;  %787 = vmatmul.f32.vlgmr.msra.gmra.mxu0 %v756_v5  ;;  %807 = vmatmul.f32.vlgmr.msra.gmra.mxu1 %v756_v5  ;;  %v2853_v45 = vld [vmem:[#allocation13_spill] sm:$0xff] }
 0x2d5   :  { %827 = vmatmul.f32.vlgmr.msra.gmra.mxu2 %v756_v5  ;;  %847 = vmatmul.f32.vlgmr.msra.gmra.mxu3 %v756_v5  ;;  %v2877_v5 = vld [vmem:[#allocation34_spill] sm:$0xff] }
 0x2d6   :  { %1093 = vmatpush.msra.mxu0 %v2256_v26  ;;  %1113 = vmatpush.msra.mxu1 %v2259_v27 }
 0x2d7   :  { %1133 = vmatpush.msra.mxu2 %v2262_v28  ;;  %1153 = vmatpush.msra.mxu3 %v2265_v29 }
 0x2d8   :  { %1094 = vmatpush.msra.mxu0 %v2268_v34  ;;  %1114 = vmatpush.msra.mxu1 %v2271_v30 }
 0x2d9   :  { %1134 = vmatpush.msra.mxu2 %v2274_v31  ;;  %1154 = vmatpush.msra.mxu3 %v2277_v32 }
 0x2da   :  { %1095 = vmatpush.msra.mxu0 %v2280_v35  ;;  %1115 = vmatpush.msra.mxu1 %v2283_v39 }
 0x2db   :  { %1135 = vmatpush.msra.mxu2 %v2286_v43  ;;  %1155 = vmatpush.msra.mxu3 %v2289_v48 }
 0x2dc   :  { %1096 = vmatpush.msra.mxu0 %v2292_v49  ;;  %1116 = vmatpush.msra.mxu1 %v2295_v36 }
 0x2dd   :  { %1136 = vmatpush.msra.mxu2 %v2298_v38  ;;  %1156 = vmatpush.msra.mxu3 %v2301_v51 }
 0x2de   :  { %1097 = vmatpush.msra.mxu0 %v2304_v50  ;;  %1117 = vmatpush.msra.mxu1 %v2307_v53 }
 0x2df   :  { %1137 = vmatpush.msra.mxu2 %v2310_v42  ;;  %1157 = vmatpush.msra.mxu3 %v2313_v54 }
 0x2e0   :  { %1098 = vmatpush.msra.mxu0 %v2316_v60  ;;  %1118 = vmatpush.msra.mxu1 %v2319_v63 }
 0x2e1   :  { %1138 = vmatpush.msra.mxu2 %v2322_v56  ;;  %1158 = vmatpush.msra.mxu3 %v2325_v55 }
 0x2e2   :  { %1099 = vmatpush.msra.mxu0 %v2328_v62  ;;  %1119 = vmatpush.msra.mxu1 %v2331_v58 }
 0x2e3   :  { %1139 = vmatpush.msra.mxu2 %v2334_v52  ;;  %1159 = vmatpush.msra.mxu3 %v2337_v59 }
 0x2e4   :  { %1100 = vmatpush.msra.mxu0 %v2340_v61  ;;  %1120 = vmatpush.msra.mxu1 %v2343_v40 }
 0x2e5   :  { %1140 = vmatpush.msra.mxu2 %v2346_v44  ;;  %1160 = vmatpush.msra.mxu3 %v2349_v57 }
 0x2e6   :  { %1101 = vmatpush.msra.mxu0 %v2352_v37  ;;  %1121 = vmatpush.msra.mxu1 %v2355_v46 }
 0x2e7   :  { %1141 = vmatpush.msra.mxu2 %v2358_v33  ;;  %1161 = vmatpush.msra.mxu3 %v2361_v0 }
 0x2e8   :  { %1102 = vmatpush.msra.mxu0 %v2364_v1  ;;  %1122 = vmatpush.msra.mxu1 %v2853_v45 }
 0x2e9   :  { %1142 = vmatpush.msra.mxu2 %v2854_v2  ;;  %1162 = vmatpush.msra.mxu3 %v2855_v3 }
 0x2ea   :  { %1103 = vmatpush.msra.mxu0 %v2856_v4  ;;  %1123 = vmatpush.msra.mxu1 %v2857_v6 }
 0x2eb   :  { %1143 = vmatpush.msra.mxu2 %v2858_v14  ;;  %1163 = vmatpush.msra.mxu3 %v2859_v17 }
 0x2ec   :  { %1104 = vmatpush.msra.mxu0 %v2860_v23  ;;  %1124 = vmatpush.msra.mxu1 %v2861_v18  ;;  %v769_v23 = vld [vmem:[#allocation4 + $0x90] sm:$0xff] }
 0x2ed   :  { %1144 = vmatpush.msra.mxu2 %v2862_v15  ;;  %1164 = vmatpush.msra.mxu3 %v2863_v12 }
 0x2ee   :  { %1105 = vmatpush.msra.mxu0 %v2864_v21  ;;  %1125 = vmatpush.msra.mxu1 %v2865_v20 }
 0x2ef   :  { %1145 = vmatpush.msra.mxu2 %v2866_v10  ;;  %1165 = vmatpush.msra.mxu3 %v2867_v11  ;;  %v2878_v11 = vld [vmem:[#allocation40_spill] sm:$0xff] }
 0x2f0   :  { %1106 = vmatpush.msra.mxu0 %v2868_v25  ;;  %1126 = vmatpush.msra.mxu1 %v2869_v8  ;;  %v2879_v25 = vld [vmem:[#allocation35_spill] sm:$0xff]  ;;  %v767_v8 = vld [vmem:[#allocation4 + $0x80] sm:$0xff] }
 0x2f1   :  { %1146 = vmatpush.msra.mxu2 %v2870_v7  ;;  %1166 = vmatpush.msra.mxu3 %v2871_v19  ;;  %v768_v7 = vld [vmem:[#allocation4 + $0x88] sm:$0xff] }
 0x2f2   :  { %1107 = vmatpush.msra.mxu0 %v2872_v47  ;;  %1127 = vmatpush.msra.mxu1 %v2873_v22 }
 0x2f3   :  { %1147 = vmatpush.msra.mxu2 %v2874_v13  ;;  %1167 = vmatpush.msra.mxu3 %v2875_v41  ;;  %v770_v13 = vld [vmem:[#allocation4 + $0x98] sm:$0xff] }
 0x2f4   :  { %1108 = vmatpush.msra.mxu0 %v2876_v24  ;;  %1128 = vmatpush.msra.mxu1 %v2877_v5 }
 0x2f5   :  { %1148 = vmatpush.msra.mxu2 %v2878_v11  ;;  %1168 = vmatpush.msra.mxu3 %v2879_v25  ;;  %v2880_v25 = vld [vmem:[#allocation28_spill] sm:$0xff] }
 0x2f6   :  { %vm1081_vm9 = vcmp.eq.s32.totalorder %v2880_v25, 5 }
 0x351   :  { %v788_v10 = vpop.f32.mrf.mxu0  ;;  %v808_v19 = vpop.f32.mrf.mxu1 }
 0x352   :  { %v851_v20 = vadd.f32 %v788_v10, %v767_v8  ;;  %v852_v47 = vadd.f32 %v808_v19, %v768_v7  ;;  %v2881_v8 = vmov 0  }
 0x354   :  { %v1444_v21 = vmul.f32 -1.442695, %v851_v20  ;;  %v1445_v22 = vmul.f32 -1.442695, %v852_v47  ;;  %v1082_v20 = vsel %vm1081_vm9, 1, %v2881_v8 }
 0x355   :  { %1084 = vperm.xlu2 %1465, %v1082_v20  }
 0x356   :  { %1530 = vpow2.f32 %v1444_v21 }
 0x357   :  { %1532 = vpow2.f32 %v1445_v22 }
 0x358   :  { %v848_v41 = vpop.f32.mrf.mxu3  ;;  %v828_v10 = vpop.f32.mrf.mxu2 }
 0x359   :  { %v854_v12 = vadd.f32 %v848_v41, %v770_v13  ;;  %v853_v47 = vadd.f32 %v828_v10, %v769_v23 }
 0x35b   :  { %v1446_v24 = vmul.f32 -1.442695, %v854_v12 }
 0x35c   :  { %v1531_v15 = vpop.eup %1530 }
 0x35d   :  { %v1533_v5 = vpop.eup %1532  ;;  %v858_v18 = vadd.f32 1.0, %v1531_v15  ;;  %1534 = vpow2.f32 %v1446_v24 }
 0x35e   :  { %v877_v11 = vadd.f32 1.0, %v1533_v5 }
 0x35f   :  { %1536 = vrcp.f32 %v858_v18  ;;  %v870_v24 = vand.u32 2147483648, %v858_v18  ;;  %v868_v25 = vand.u32 2147483647, %v858_v18  ;;  %vm864_vm12 = vweird.f32 %v858_v18 }
 0x360   :  { %1538 = vrcp.f32 %v877_v11  ;;  %v889_v5 = vand.u32 2147483648, %v877_v11  ;;  %v887_v8 = vand.u32 2147483647, %v877_v11  ;;  %vm883_vm13 = vweird.f32 %v877_v11 }
 0x361   :  { %v871_v23 = vor.u32 1.1754944e-38, %v870_v24  ;;  %vm869_vm0 = vcmp.eq.f32.partialorder %v868_v25, 8.507059e+37  ;;  %v924_v25 = vpop.permute.xlu2 %923 }
 0x362   :  { %vm888_vm1 = vcmp.eq.f32.partialorder %v887_v8, 8.507059e+37  ;;  %vm925_vm6 = vcmp.eq.s32.totalorder %v924_v25, 1 }
 0x363   :  { %v1535_v7 = vpop.eup %1534 }
 0x364   :  { %v897_v21 = vadd.f32 1.0, %v1535_v7 }
 0x365   :  { %v1537_v19 = vpop.eup %1536 }
 0x366   :  { %v1539_v22 = vpop.eup %1538  ;;  %v860_v12 = vmul.f32 %v1537_v19, %v858_v18  ;;  %1540 = vrcp.f32 %v897_v21  ;;  %vm865_vm10 = vweird.f32 %v1537_v19  ;;  %vm903_vm3 = vweird.f32 %v897_v21 }
 0x367   :  { %v879_v13 = vmul.f32 %v1539_v22, %v877_v11  ;;  %1542 = vtanh.f32 %v853_v47  ;;  %vm884_vm11 = vweird.f32 %v1539_v22  ;;  %vm866_vm14 = vmor %vm864_vm12, %vm865_vm10 }
 0x368   :  { %v861_v15 = vsub.f32 1.0, %v860_v12  ;;  %vm885_vm15 = vmor %vm883_vm13, %vm884_vm11  ;;  %v890_v12 = vor.u32 1.1754944e-38, %v889_v5 }
 0x369   :  { %v880_v41 = vsub.f32 1.0, %v879_v13 }
 0x36a   :  { %v862_v17 = vmul.f32 %v1537_v19, %v861_v15 }
 0x36b   :  { %v881_v14 = vmul.f32 %v1539_v22, %v880_v41 }
 0x36c   :  { %v1541_v6 = vpop.eup %1540  ;;  %v863_v20 = vadd.f32 %v1537_v19, %v862_v17 }
 0x36d   :  { %v882_v10 = vadd.f32 %v1539_v22, %v881_v14  ;;  %v899_v7 = vmul.f32 %v1541_v6, %v897_v21  ;;  %v1543_v47 = vpop.eup %1542  ;;  %vm904_vm2 = vweird.f32 %v1541_v6  ;;  %v909_v14 = vand.u32 2147483648, %v897_v21 }
 0x36e   :  { %v867_v13 = vsel %vm866_vm14, %v1537_v19, %v863_v20  ;;  %v907_v19 = vand.u32 2147483647, %v897_v21  ;;  %vm905_vm4 = vmor %vm903_vm3, %vm904_vm2  ;;  %v2909_v20 = vld [vmem:[#allocation28_spill] sm:$0xff] }
 0x36f   :  { %v872_v4 = vsel %vm869_vm0, %v871_v23, %v867_v13  ;;  %v886_v15 = vsel %vm885_vm15, %v1539_v22, %v882_v10  ;;  %v900_v3 = vsub.f32 1.0, %v899_v7  ;;  %v910_v22 = vor.u32 1.1754944e-38, %v909_v14  ;;  %v930_v23 = vld [vmem:[#allocation4 + $0xb0] sm:$0xff] }
 0x370   :  { %v891_v41 = vsel %vm888_vm1, %v890_v12, %v886_v15  ;;  %v914_v2 = vmul.f32 %v1543_v47, %v872_v4  ;;  %vm908_vm5 = vcmp.eq.f32.partialorder %v907_v19, 8.507059e+37  ;;  %vm1242_vm7 = vcmp.eq.s32.totalorder %v2909_v20, 6 }
 0x371   :  { %v913_v45 = vmul.f32 %v891_v41, %v2451_v9  ;;  %v901_v17 = vmul.f32 %v1541_v6, %v900_v3  ;;  %v2910_v7 = vmov 0  }
 0x372   :  { %v1243_v12 = vsel %vm1242_vm7, 1, %v2910_v7 }
 0x373   :  { %v2524_v18 = vadd.f32 %v914_v2, %v913_v45  ;;  %v902_v11 = vadd.f32 %v1541_v6, %v901_v17  ;;  %1245 = vperm.xlu0 %1463, %v1243_v12  }
 0x375   :  { %1544 = vtanh.f32 %v2524_v18  ;;  %v906_v24 = vsel %vm905_vm4, %v1541_v6, %v902_v11 }
 0x376   :  { %v911_v5 = vsel %vm908_vm5, %v910_v22, %v906_v24  ;;  %vm1403_vm5 = vcmp.eq.s32.totalorder %v2909_v20, 7 }
 0x37b   :  { %v1545_v8 = vpop.eup %1544 }
 0x37c   :  { %v917_v4 = vmul.f32 %v1545_v8, %v911_v5 }
 0x37e   :  { %v2528_v9 = vsel %vm925_vm6, %v917_v4, %v2455_v16  ;;  %948 = vmatmul.f32.vlgmr.msrb.gmra.mxu0 %v917_v4  ;;  %968 = vmatmul.f32.vlgmr.msrb.gmra.mxu1 %v917_v4 }
 0x37f   :  { %988 = vmatmul.f32.vlgmr.msrb.gmra.mxu2 %v917_v4  ;;  %1008 = vmatmul.f32.vlgmr.msrb.gmra.mxu3 %v917_v4 }
 0x380   :  { %1254 = vmatpush.msrb.mxu0 %v2256_v26  ;;  %1274 = vmatpush.msrb.mxu1 %v2259_v27  ;;  %v2882_v26 = vld [vmem:[#allocation13_spill] sm:$0xff]  ;;  %v2883_v27 = vld [vmem:[#allocation27_spill] sm:$0xff] }
 0x381   :  { %1294 = vmatpush.msrb.mxu2 %v2262_v28  ;;  %1314 = vmatpush.msrb.mxu3 %v2265_v29  ;;  %v2884_v28 = vld [vmem:[#allocation14_spill] sm:$0xff]  ;;  %v2885_v29 = vld [vmem:[#allocation15_spill] sm:$0xff] }
 0x382   :  { %1255 = vmatpush.msrb.mxu0 %v2268_v34  ;;  %1275 = vmatpush.msrb.mxu1 %v2271_v30  ;;  %v2886_v34 = vld [vmem:[#allocation16_spill] sm:$0xff] }
 0x383   :  { %1295 = vmatpush.msrb.mxu2 %v2274_v31  ;;  %1315 = vmatpush.msrb.mxu3 %v2277_v32  ;;  %v2887_v30 = vld [vmem:[#allocation32_spill] sm:$0xff]  ;;  %v2888_v31 = vld [vmem:[#allocation17_spill] sm:$0xff]  ;;  %v2889_v32 = vld [vmem:[#allocation18_spill] sm:$0xff] }
 0x384   :  { %1256 = vmatpush.msrb.mxu0 %v2280_v35  ;;  %1276 = vmatpush.msrb.mxu1 %v2283_v39  ;;  %v2890_v35 = vld [vmem:[#allocation19_spill] sm:$0xff]  ;;  %v2891_v39 = vld [vmem:[#allocation36_spill] sm:$0xff] }
 0x385   :  { %1296 = vmatpush.msrb.mxu2 %v2286_v43  ;;  %1316 = vmatpush.msrb.mxu3 %v2289_v48  ;;  %v2892_v43 = vld [vmem:[#allocation20_spill] sm:$0xff]  ;;  %v2893_v48 = vld [vmem:[#allocation21_spill] sm:$0xff] }
 0x386   :  { %1257 = vmatpush.msrb.mxu0 %v2292_v49  ;;  %1277 = vmatpush.msrb.mxu1 %v2295_v36  ;;  %v2894_v49 = vld [vmem:[#allocation22_spill] sm:$0xff]  ;;  %v2895_v36 = vld [vmem:[#allocation37_spill] sm:$0xff] }
 0x387   :  { %1297 = vmatpush.msrb.mxu2 %v2298_v38  ;;  %1317 = vmatpush.msrb.mxu3 %v2301_v51  ;;  %v2896_v38 = vld [vmem:[#allocation23_spill] sm:$0xff]  ;;  %v2897_v51 = vld [vmem:[#allocation24_spill] sm:$0xff] }
 0x388   :  { %1258 = vmatpush.msrb.mxu0 %v2304_v50  ;;  %1278 = vmatpush.msrb.mxu1 %v2307_v53  ;;  %v2898_v50 = vld [vmem:[#allocation25_spill] sm:$0xff]  ;;  %v2899_v53 = vld [vmem:[#allocation38_spill] sm:$0xff] }
 0x389   :  { %1298 = vmatpush.msrb.mxu2 %v2310_v42  ;;  %1318 = vmatpush.msrb.mxu3 %v2313_v54  ;;  %v2900_v42 = vld [vmem:[#allocation26_spill] sm:$0xff]  ;;  %v2901_v54 = vld [vmem:[#allocation29_spill] sm:$0xff] }
 0x38a   :  { %1259 = vmatpush.msrb.mxu0 %v2316_v60  ;;  %1279 = vmatpush.msrb.mxu1 %v2319_v63  ;;  %v2902_v60 = vld [vmem:[#allocation30_spill] sm:$0xff]  ;;  %v2903_v63 = vld [vmem:[#allocation39_spill] sm:$0xff] }
 0x38b   :  { %1299 = vmatpush.msrb.mxu2 %v2322_v56  ;;  %1319 = vmatpush.msrb.mxu3 %v2325_v55  ;;  %v2904_v56 = vld [vmem:[#allocation31_spill] sm:$0xff]  ;;  %v2905_v55 = vld [vmem:[#allocation33_spill] sm:$0xff] }
 0x38c   :  { %1260 = vmatpush.msrb.mxu0 %v2328_v62  ;;  %1280 = vmatpush.msrb.mxu1 %v2331_v58  ;;  %v2906_v62 = vld [vmem:[#allocation34_spill] sm:$0xff]  ;;  %v2907_v58 = vld [vmem:[#allocation40_spill] sm:$0xff] }
 0x38d   :  { %1300 = vmatpush.msrb.mxu2 %v2334_v52  ;;  %1320 = vmatpush.msrb.mxu3 %v2337_v59  ;;  %v2908_v52 = vld [vmem:[#allocation35_spill] sm:$0xff]  ;;  %v928_v59 = vld [vmem:[#allocation4 + $0xa0] sm:$0xff] }
 0x38e   :  { %1261 = vmatpush.msrb.mxu0 %v2340_v61  ;;  %1281 = vmatpush.msrb.mxu1 %v2343_v40  ;;  %v929_v61 = vld [vmem:[#allocation4 + $0xa8] sm:$0xff] }
 0x38f   :  { %1301 = vmatpush.msrb.mxu2 %v2346_v44  ;;  %1321 = vmatpush.msrb.mxu3 %v2349_v57 }
 0x390   :  { %1262 = vmatpush.msrb.mxu0 %v2352_v37  ;;  %1282 = vmatpush.msrb.mxu1 %v2355_v46 }
 0x391   :  { %1302 = vmatpush.msrb.mxu2 %v2358_v33  ;;  %1322 = vmatpush.msrb.mxu3 %v2361_v0  ;;  %v931_v0 = vld [vmem:[#allocation4 + $0xb8] sm:$0xff] }
 0x392   :  { %1263 = vmatpush.msrb.mxu0 %v2364_v1  ;;  %1283 = vmatpush.msrb.mxu1 %v2882_v26 }
 0x393   :  { %1303 = vmatpush.msrb.mxu2 %v2883_v27  ;;  %1323 = vmatpush.msrb.mxu3 %v2884_v28 }
 0x394   :  { %1264 = vmatpush.msrb.mxu0 %v2885_v29  ;;  %1284 = vmatpush.msrb.mxu1 %v2886_v34 }
 0x395   :  { %1304 = vmatpush.msrb.mxu2 %v2887_v30  ;;  %1324 = vmatpush.msrb.mxu3 %v2888_v31 }
 0x396   :  { %1265 = vmatpush.msrb.mxu0 %v2889_v32  ;;  %1285 = vmatpush.msrb.mxu1 %v2890_v35 }
 0x397   :  { %1305 = vmatpush.msrb.mxu2 %v2891_v39  ;;  %1325 = vmatpush.msrb.mxu3 %v2892_v43 }
 0x398   :  { %1266 = vmatpush.msrb.mxu0 %v2893_v48  ;;  %1286 = vmatpush.msrb.mxu1 %v2894_v49 }
 0x399   :  { %1306 = vmatpush.msrb.mxu2 %v2895_v36  ;;  %1326 = vmatpush.msrb.mxu3 %v2896_v38 }
 0x39a   :  { %1267 = vmatpush.msrb.mxu0 %v2897_v51  ;;  %1287 = vmatpush.msrb.mxu1 %v2898_v50 }
 0x39b   :  { %1307 = vmatpush.msrb.mxu2 %v2899_v53  ;;  %1327 = vmatpush.msrb.mxu3 %v2900_v42 }
 0x39c   :  { %1268 = vmatpush.msrb.mxu0 %v2901_v54  ;;  %1288 = vmatpush.msrb.mxu1 %v2902_v60 }
 0x39d   :  { %1308 = vmatpush.msrb.mxu2 %v2903_v63  ;;  %1328 = vmatpush.msrb.mxu3 %v2904_v56 }
 0x39e   :  { %1269 = vmatpush.msrb.mxu0 %v2905_v55  ;;  %1289 = vmatpush.msrb.mxu1 %v2906_v62 }
 0x39f   :  { %1309 = vmatpush.msrb.mxu2 %v2907_v58  ;;  %1329 = vmatpush.msrb.mxu3 %v2908_v52  ;;  %v1089_v52 = vld [vmem:[#allocation4 + $0xc0] sm:$0xff] }
 0x3af   :  { %v1085_v60 = vpop.permute.xlu2 %1084 }
 0x3b0   :  { %vm1086_vm4 = vcmp.eq.s32.totalorder %v1085_v60, 1 }
 0x3fb   :  { %v949_v40 = vpop.f32.mrf.mxu0  ;;  %v969_v44 = vpop.f32.mrf.mxu1 }
 0x3fc   :  { %v1012_v57 = vadd.f32 %v949_v40, %v928_v59  ;;  %v1013_v37 = vadd.f32 %v969_v44, %v929_v61  ;;  %v1090_v59 = vld [vmem:[#allocation4 + $0xc8] sm:$0xff] }
 0x3fe   :  { %v1447_v46 = vmul.f32 -1.442695, %v1012_v57  ;;  %v1448_v33 = vmul.f32 -1.442695, %v1013_v37 }
 0x400   :  { %1546 = vpow2.f32 %v1447_v46 }
 0x401   :  { %1548 = vpow2.f32 %v1448_v33  ;;  %v1092_v33 = vld [vmem:[#allocation4 + $0xd8] sm:$0xff] }
 0x402   :  { %v1009_v1 = vpop.f32.mrf.mxu3  ;;  %v989_v10 = vpop.f32.mrf.mxu2 }
 0x403   :  { %v1015_v16 = vadd.f32 %v1009_v1, %v931_v0  ;;  %v1014_v41 = vadd.f32 %v989_v10, %v930_v23  ;;  %v1404_v23 = vsel %vm1403_vm5, 1, %v2910_v7 }
 0x404   :  { %1406 = vperm.xlu1 %1464, %v1404_v23  }
 0x405   :  { %v1449_v45 = vmul.f32 -1.442695, %v1015_v16 }
 0x406   :  { %v1547_v2 = vpop.eup %1546 }
 0x407   :  { %v1549_v3 = vpop.eup %1548  ;;  %v1019_v6 = vadd.f32 1.0, %v1547_v2  ;;  %1550 = vpow2.f32 %v1449_v45 }
 0x408   :  { %v1038_v21 = vadd.f32 1.0, %v1549_v3 }
 0x409   :  { %1552 = vrcp.f32 %v1019_v6  ;;  %v1031_v24 = vand.u32 2147483648, %v1019_v6  ;;  %v1029_v5 = vand.u32 2147483647, %v1019_v6  ;;  %vm1025_vm10 = vweird.f32 %v1019_v6 }
 0x40a   :  { %1554 = vrcp.f32 %v1038_v21  ;;  %v1050_v22 = vand.u32 2147483648, %v1038_v21  ;;  %v1048_v26 = vand.u32 2147483647, %v1038_v21  ;;  %vm1044_vm11 = vweird.f32 %v1038_v21 }
 0x40b   :  { %v1032_v29 = vor.u32 1.1754944e-38, %v1031_v24  ;;  %vm1030_vm14 = vcmp.eq.f32.partialorder %v1029_v5, 8.507059e+37 }
 0x40c   :  { %v1051_v31 = vor.u32 1.1754944e-38, %v1050_v22  ;;  %vm1049_vm15 = vcmp.eq.f32.partialorder %v1048_v26, 8.507059e+37 }
 0x40d   :  { %v1551_v13 = vpop.eup %1550 }
 0x40e   :  { %v1058_v47 = vadd.f32 1.0, %v1551_v13 }
 0x40f   :  { %v1553_v15 = vpop.eup %1552 }
 0x410   :  { %v1555_v17 = vpop.eup %1554  ;;  %v1021_v11 = vmul.f32 %v1553_v15, %v1019_v6  ;;  %1556 = vrcp.f32 %v1058_v47  ;;  %vm1026_vm8 = vweird.f32 %v1553_v15  ;;  %v1070_v42 = vand.u32 2147483648, %v1058_v47  ;;  %v1091_v6 = vld [vmem:[#allocation4 + $0xd0] sm:$0xff] }
 0x411   :  { %v1040_v14 = vmul.f32 %v1555_v17, %v1038_v21  ;;  %1558 = vtanh.f32 %v1014_v41  ;;  %vm1045_vm9 = vweird.f32 %v1555_v17  ;;  %vm1027_vm12 = vmor %vm1025_vm10, %vm1026_vm8  ;;  %vm1064_vm1 = vweird.f32 %v1058_v47 }
 0x412   :  { %v1022_v19 = vsub.f32 1.0, %v1021_v11  ;;  %vm1046_vm13 = vmor %vm1044_vm11, %vm1045_vm9  ;;  %v1068_v54 = vand.u32 2147483647, %v1058_v47  ;;  %v1071_v56 = vor.u32 1.1754944e-38, %v1070_v42 }
 0x413   :  { %v1041_v25 = vsub.f32 1.0, %v1040_v14 }
 0x414   :  { %v1023_v8 = vmul.f32 %v1553_v15, %v1022_v19  ;;  %vm1069_vm3 = vcmp.eq.f32.partialorder %v1068_v54, 8.507059e+37 }
 0x415   :  { %v1042_v4 = vmul.f32 %v1555_v17, %v1041_v25 }
 0x416   :  { %v1557_v27 = vpop.eup %1556  ;;  %v1024_v28 = vadd.f32 %v1553_v15, %v1023_v8 }
 0x417   :  { %v1043_v34 = vadd.f32 %v1555_v17, %v1042_v4  ;;  %v1060_v30 = vmul.f32 %v1557_v27, %v1058_v47  ;;  %v1559_v35 = vpop.eup %1558  ;;  %vm1065_vm0 = vweird.f32 %v1557_v27 }
 0x418   :  { %v1028_v32 = vsel %vm1027_vm12, %v1553_v15, %v1024_v28  ;;  %vm1066_vm2 = vmor %vm1064_vm1, %vm1065_vm0 }
 0x419   :  { %v1033_v39 = vsel %vm1030_vm14, %v1032_v29, %v1028_v32  ;;  %v1047_v43 = vsel %vm1046_vm13, %v1555_v17, %v1043_v34  ;;  %v1061_v48 = vsub.f32 1.0, %v1060_v30 }
 0x41a   :  { %v1052_v49 = vsel %vm1049_vm15, %v1051_v31, %v1047_v43  ;;  %v1075_v36 = vmul.f32 %v1559_v35, %v1033_v39 }
 0x41b   :  { %v1074_v38 = vmul.f32 %v1052_v49, %v2524_v18  ;;  %v1062_v51 = vmul.f32 %v1557_v27, %v1061_v48 }
 0x41d   :  { %v2597_v50 = vadd.f32 %v1075_v36, %v1074_v38  ;;  %v1063_v53 = vadd.f32 %v1557_v27, %v1062_v51 }
 0x41f   :  { %1560 = vtanh.f32 %v2597_v50  ;;  %v1067_v63 = vsel %vm1066_vm2, %v1557_v27, %v1063_v53  ;;  %v1246_v53 = vpop.permute.xlu0 %1245 }
 0x420   :  { %v1072_v62 = vsel %vm1069_vm3, %v1071_v56, %v1067_v63  ;;  %vm1247_vm2 = vcmp.eq.s32.totalorder %v1246_v53, 1 }
 0x425   :  { %v1561_v55 = vpop.eup %1560 }
 0x426   :  { %v1078_v58 = vmul.f32 %v1561_v55, %v1072_v62  ;;  %v1250_v55 = vld [vmem:[#allocation4 + $0xe0] sm:$0xff]  ;;  %v1251_v62 = vld [vmem:[#allocation4 + $0xe8] sm:$0xff] }
 0x428   :  { %v2601_v18 = vsel %vm1086_vm4, %v1078_v58, %v2528_v9  ;;  %1109 = vmatmul.f32.vlgmr.msra.gmra.mxu0 %v1078_v58  ;;  %1129 = vmatmul.f32.vlgmr.msra.gmra.mxu1 %v1078_v58 }
 0x429   :  { %1149 = vmatmul.f32.vlgmr.msra.gmra.mxu2 %v1078_v58  ;;  %1169 = vmatmul.f32.vlgmr.msra.gmra.mxu3 %v1078_v58 }
 0x4a5   :  { %v1110_v61 = vpop.f32.mrf.mxu0  ;;  %v1130_v40 = vpop.f32.mrf.mxu1 }
 0x4a6   :  { %v1173_v44 = vadd.f32 %v1110_v61, %v1089_v52  ;;  %v1174_v57 = vadd.f32 %v1130_v40, %v1090_v59 }
 0x4a8   :  { %v1450_v37 = vmul.f32 -1.442695, %v1173_v44  ;;  %v1451_v46 = vmul.f32 -1.442695, %v1174_v57  ;;  %v1253_v57 = vld [vmem:[#allocation4 + $0xf8] sm:$0xff] }
 0x4aa   :  { %1562 = vpow2.f32 %v1450_v37 }
 0x4ab   :  { %1564 = vpow2.f32 %v1451_v46 }
 0x4ac   :  { %v1170_v0 = vpop.f32.mrf.mxu3  ;;  %v1150_v21 = vpop.f32.mrf.mxu2 }
 0x4ad   :  { %v1176_v1 = vadd.f32 %v1170_v0, %v1092_v33  ;;  %v1175_v47 = vadd.f32 %v1150_v21, %v1091_v6 }
 0x4af   :  { %v1452_v16 = vmul.f32 -1.442695, %v1176_v1 }
 0x4b0   :  { %v1563_v9 = vpop.eup %1562 }
 0x4b1   :  { %v1565_v45 = vpop.eup %1564  ;;  %v1180_v2 = vadd.f32 1.0, %v1563_v9  ;;  %1566 = vpow2.f32 %v1452_v16  ;;  %v1252_v9 = vld [vmem:[#allocation4 + $0xf0] sm:$0xff] }
 0x4b2   :  { %v1199_v3 = vadd.f32 1.0, %v1565_v45 }
 0x4b3   :  { %1568 = vrcp.f32 %v1180_v2  ;;  %v1192_v19 = vand.u32 2147483648, %v1180_v2  ;;  %v1190_v20 = vand.u32 2147483647, %v1180_v2  ;;  %vm1186_vm8 = vweird.f32 %v1180_v2 }
 0x4b4   :  { %1570 = vrcp.f32 %v1199_v3  ;;  %v1211_v25 = vand.u32 2147483648, %v1199_v3  ;;  %v1209_v7 = vand.u32 2147483647, %v1199_v3  ;;  %vm1205_vm9 = vweird.f32 %v1199_v3 }
 0x4b5   :  { %v1193_v4 = vor.u32 1.1754944e-38, %v1192_v19  ;;  %vm1191_vm12 = vcmp.eq.f32.partialorder %v1190_v20, 8.507059e+37 }
 0x4b6   :  { %v1212_v28 = vor.u32 1.1754944e-38, %v1211_v25  ;;  %vm1210_vm13 = vcmp.eq.f32.partialorder %v1209_v7, 8.507059e+37 }
 0x4b7   :  { %v1567_v10 = vpop.eup %1566 }
 0x4b8   :  { %v1219_v12 = vadd.f32 1.0, %v1567_v10 }
 0x4b9   :  { %v1569_v13 = vpop.eup %1568 }
 0x4ba   :  { %v1571_v15 = vpop.eup %1570  ;;  %v1182_v41 = vmul.f32 %v1569_v13, %v1180_v2  ;;  %1572 = vrcp.f32 %v1219_v12  ;;  %vm1187_vm6 = vweird.f32 %v1569_v13  ;;  %v1231_v38 = vand.u32 2147483648, %v1219_v12 }
 0x4bb   :  { %v1201_v17 = vmul.f32 %v1571_v15, %v1199_v3  ;;  %1574 = vtanh.f32 %v1175_v47  ;;  %vm1206_vm7 = vweird.f32 %v1571_v15  ;;  %vm1188_vm10 = vmor %vm1186_vm8, %vm1187_vm6  ;;  %vm1225_vm15 = vweird.f32 %v1219_v12 }
 0x4bc   :  { %v1183_v11 = vsub.f32 1.0, %v1182_v41  ;;  %vm1207_vm11 = vmor %vm1205_vm9, %vm1206_vm7  ;;  %v1229_v51 = vand.u32 2147483647, %v1219_v12  ;;  %v1232_v54 = vor.u32 1.1754944e-38, %v1231_v38  ;;  %v1407_v38 = vpop.permute.xlu1 %1406 }
 0x4bd   :  { %v1202_v14 = vsub.f32 1.0, %v1201_v17 }
 0x4be   :  { %v1184_v24 = vmul.f32 %v1569_v13, %v1183_v11  ;;  %vm1230_vm1 = vcmp.eq.f32.partialorder %v1229_v51, 8.507059e+37 }
 0x4bf   :  { %v1203_v22 = vmul.f32 %v1571_v15, %v1202_v14 }
 0x4c0   :  { %v1573_v8 = vpop.eup %1572  ;;  %v1185_v5 = vadd.f32 %v1569_v13, %v1184_v24 }
 0x4c1   :  { %v1204_v26 = vadd.f32 %v1571_v15, %v1203_v22  ;;  %v1221_v27 = vmul.f32 %v1573_v8, %v1219_v12  ;;  %v1575_v34 = vpop.eup %1574  ;;  %vm1226_vm14 = vweird.f32 %v1573_v8 }
 0x4c2   :  { %v1189_v29 = vsel %vm1188_vm10, %v1569_v13, %v1185_v5  ;;  %vm1227_vm0 = vmor %vm1225_vm15, %vm1226_vm14  ;;  %vm1408_vm15 = vcmp.eq.s32.totalorder %v1407_v38, 1 }
 0x4c3   :  { %v1194_v30 = vsel %vm1191_vm12, %v1193_v4, %v1189_v29  ;;  %v1208_v31 = vsel %vm1207_vm11, %v1571_v15, %v1204_v26  ;;  %v1222_v32 = vsub.f32 1.0, %v1221_v27 }
 0x4c4   :  { %v1213_v35 = vsel %vm1210_vm13, %v1212_v28, %v1208_v31  ;;  %v1236_v39 = vmul.f32 %v1575_v34, %v1194_v30 }
 0x4c5   :  { %v1235_v43 = vmul.f32 %v1213_v35, %v2597_v50  ;;  %v1223_v48 = vmul.f32 %v1573_v8, %v1222_v32 }
 0x4c7   :  { %v2606_v49 = vadd.f32 %v1236_v39, %v1235_v43  ;;  %v1224_v36 = vadd.f32 %v1573_v8, %v1223_v48 }
 0x4c9   :  { %1576 = vtanh.f32 %v2606_v49  ;;  %v1228_v42 = vsel %vm1227_vm0, %v1573_v8, %v1224_v36 }
 0x4ca   :  { %v1233_v63 = vsel %vm1230_vm1, %v1232_v54, %v1228_v42 }
 0x4cf   :  { %v1577_v60 = vpop.eup %1576 }
 0x4d0   :  { %v1239_v56 = vmul.f32 %v1577_v60, %v1233_v63 }
 0x4d2   :  { %v2610_v50 = vsel %vm1247_vm2, %v1239_v56, %v2601_v18  ;;  %1270 = vmatmul.f32.vlgmr.msrb.gmra.mxu0 %v1239_v56  ;;  %1290 = vmatmul.f32.vlgmr.msrb.gmra.mxu1 %v1239_v56 }
 0x4d3   :  { %1310 = vmatmul.f32.vlgmr.msrb.gmra.mxu2 %v1239_v56  ;;  %1330 = vmatmul.f32.vlgmr.msrb.gmra.mxu3 %v1239_v56 }
 0x54f   :  { %v1271_v58 = vpop.f32.mrf.mxu0  ;;  %v1291_v52 = vpop.f32.mrf.mxu1 }
 0x550   :  { %v1334_v59 = vadd.f32 %v1271_v58, %v1250_v55  ;;  %v1335_v61 = vadd.f32 %v1291_v52, %v1251_v62 }
 0x552   :  { %v1453_v40 = vmul.f32 -1.442695, %v1334_v59  ;;  %v1454_v44 = vmul.f32 -1.442695, %v1335_v61 }
 0x554   :  { %1578 = vpow2.f32 %v1453_v40 }
 0x555   :  { %1580 = vpow2.f32 %v1454_v44 }
 0x556   :  { %v1331_v37 = vpop.f32.mrf.mxu3  ;;  %v1311_v45 = vpop.f32.mrf.mxu2 }
 0x557   :  { %v1337_v46 = vadd.f32 %v1331_v37, %v1253_v57  ;;  %v1336_v21 = vadd.f32 %v1311_v45, %v1252_v9 }
 0x559   :  { %v1455_v33 = vmul.f32 -1.442695, %v1337_v46 }
 0x55a   :  { %v1579_v18 = vpop.eup %1578 }
 0x55b   :  { %v1581_v0 = vpop.eup %1580  ;;  %v1341_v1 = vadd.f32 1.0, %v1579_v18  ;;  %1582 = vpow2.f32 %v1455_v33 }
 0x55c   :  { %v1360_v16 = vadd.f32 1.0, %v1581_v0 }
 0x55d   :  { %1584 = vrcp.f32 %v1341_v1  ;;  %v1353_v15 = vand.u32 2147483648, %v1341_v1  ;;  %v1351_v11 = vand.u32 2147483647, %v1341_v1  ;;  %vm1347_vm5 = vweird.f32 %v1341_v1 }
 0x55e   :  { %1586 = vrcp.f32 %v1360_v16  ;;  %v1372_v41 = vand.u32 2147483648, %v1360_v16  ;;  %v1370_v19 = vand.u32 2147483647, %v1360_v16  ;;  %vm1366_vm6 = vweird.f32 %v1360_v16 }
 0x55f   :  { %v1354_v20 = vor.u32 1.1754944e-38, %v1353_v15  ;;  %vm1352_vm9 = vcmp.eq.f32.partialorder %v1351_v11, 8.507059e+37 }
 0x560   :  { %v1373_v8 = vor.u32 1.1754944e-38, %v1372_v41  ;;  %vm1371_vm10 = vcmp.eq.f32.partialorder %v1370_v19, 8.507059e+37 }
 0x561   :  { %v1583_v2 = vpop.eup %1582 }
 0x562   :  { %v1380_v3 = vadd.f32 1.0, %v1583_v2 }
 0x563   :  { %v1585_v6 = vpop.eup %1584 }
 0x564   :  { %v1587_v23 = vpop.eup %1586  ;;  %v1343_v10 = vmul.f32 %v1585_v6, %v1341_v1  ;;  %1588 = vrcp.f32 %v1380_v3  ;;  %vm1348_vm3 = vweird.f32 %v1585_v6  ;;  %v1392_v39 = vand.u32 2147483648, %v1380_v3 }
 0x565   :  { %v1362_v12 = vmul.f32 %v1587_v23, %v1360_v16  ;;  %1590 = vtanh.f32 %v1336_v21  ;;  %vm1367_vm4 = vweird.f32 %v1587_v23  ;;  %vm1349_vm7 = vmor %vm1347_vm5, %vm1348_vm3  ;;  %vm1386_vm12 = vweird.f32 %v1380_v3 }
 0x566   :  { %v1344_v13 = vsub.f32 1.0, %v1343_v10  ;;  %vm1368_vm8 = vmor %vm1366_vm6, %vm1367_vm4  ;;  %v1390_v43 = vand.u32 2147483647, %v1380_v3  ;;  %v1393_v36 = vor.u32 1.1754944e-38, %v1392_v39 }
 0x567   :  { %v1363_v47 = vsub.f32 1.0, %v1362_v12 }
 0x568   :  { %v1345_v17 = vmul.f32 %v1585_v6, %v1344_v13  ;;  %vm1391_vm14 = vcmp.eq.f32.partialorder %v1390_v43, 8.507059e+37 }
 0x569   :  { %v1364_v14 = vmul.f32 %v1587_v23, %v1363_v47 }
 0x56a   :  { %v1589_v25 = vpop.eup %1588  ;;  %v1346_v24 = vadd.f32 %v1585_v6, %v1345_v17 }
 0x56b   :  { %v1365_v22 = vadd.f32 %v1587_v23, %v1364_v14  ;;  %v1382_v7 = vmul.f32 %v1589_v25, %v1380_v3  ;;  %v1591_v4 = vpop.eup %1590  ;;  %vm1387_vm11 = vweird.f32 %v1589_v25 }
 0x56c   :  { %v1350_v5 = vsel %vm1349_vm7, %v1585_v6, %v1346_v24  ;;  %vm1388_vm13 = vmor %vm1386_vm12, %vm1387_vm11 }
 0x56d   :  { %v1355_v26 = vsel %vm1352_vm9, %v1354_v20, %v1350_v5  ;;  %v1369_v27 = vsel %vm1368_vm8, %v1587_v23, %v1365_v22  ;;  %v1383_v28 = vsub.f32 1.0, %v1382_v7 }
 0x56e   :  { %v1374_v29 = vsel %vm1371_vm10, %v1373_v8, %v1369_v27  ;;  %v1397_v34 = vmul.f32 %v1591_v4, %v1355_v26 }
 0x56f   :  { %v1396_v30 = vmul.f32 %v1374_v29, %v2606_v49  ;;  %v1384_v31 = vmul.f32 %v1589_v25, %v1383_v28 }
 0x571   :  { %v1398_v32 = vadd.f32 %v1397_v34, %v1396_v30  ;;  %v1385_v35 = vadd.f32 %v1589_v25, %v1384_v31 }
 0x573   :  { %1592 = vtanh.f32 %v1398_v32  ;;  %v1389_v48 = vsel %vm1388_vm13, %v1589_v25, %v1385_v35 }
 0x574   :  { %v1394_v51 = vsel %vm1391_vm14, %v1393_v36, %v1389_v48 }
 0x579   :  { %v1593_v49 = vpop.eup %1592 }
 0x57a   :  { %v1400_v53 = vmul.f32 %v1593_v49, %v1394_v51 }
 0x57c   :  { %v1409_v42 = vsel %vm1408_vm15, %v1400_v53, %v2610_v50 }
 0x57d   :  { %1412 = vst [vmem:[#allocation9] sm:$0xff] %v1409_v42 }
 0x57e   :  { %1423 = dma.vmem_to_hbm [thread:$0]  %s1419_s24, 128, %s1421_s27, [#allocation6]  }
 0x57f   :  { %1734 = dma.done.wait [#allocation6], 128  }
 0x580   :  { %1735 = vsyncadd [#allocation6], 4294967168 }
 0x581   :  { %1428 = vsyncpa [#allocation5], 1 }
 0x582   :  { %1429 = vsyncpa [#allocation8], 1 }
 0x583   :  { %1430 = vsyncpa [#allocation6], 1 }

</bundles_post_ra>
